<compile_context>
chip_gen: v6e
topology: v6e:2x2x1
jax: 0.10.0
libtpu: 0.0.40
codegen_flags: <defaults>
</compile_context>

<pallas_src>
import functools
import math

import jax
import jax.numpy as jnp
from jax.experimental import pallas as pl
from jax.experimental.pallas import tpu as pltpu


def _round_up(x, m):
    return (x + m - 1) // m * m


# ----------------------------------------------------------------------------
# Pallas kernel: in-register im2col (tap concat) -> single matmul -> BN+ReLU
# ----------------------------------------------------------------------------
def _atrous_conv_bn_relu_kernel(x_ref, w_ref, c_ref, o_ref,
                                *, kh, kw, dil, toh, ow, cinp):
    """One grid step = TOH dense output rows of one image, all output channels.

    x_ref : (1, Hp, Wp, Cinp)        bf16  whole padded image (same block over t)
    w_ref : (kh*kw*Cinp, Cout)       bf16  tap-concatenated, BN-scale-folded weights
    c_ref : (1, Cout)                f32   folded BN shift (includes conv bias)
    o_ref : (1, TOH*OW, Cout)        out dtype (lane dim = full Cout, no padding)
    """
    t = pl.program_id(1)
    row0 = pl.multiple_of(t * toh, toh)

    # In-kernel im2col: build the A slab (TOH*OW, kh*kw*Cinp) by concatenating
    # the dilated tap slices along K.  No HBM patch matrix, no VMEM scratch.
    taps = []
    for i in range(kh):                 # unrolled static tap loop
        for j in range(kw):
            xs = x_ref[0, pl.ds(row0 + i * dil, toh), pl.ds(j * dil, ow), :]
            taps.append(xs.reshape(toh * ow, cinp))
    a = jnp.concatenate(taps, axis=-1)              # (TOH*OW, kh*kw*Cinp) bf16

    # Single big-K MXU matmul, f32 accumulation.
    y = jnp.dot(a, w_ref[...], preferred_element_type=jnp.float32)

    # Epilogue: folded-BN shift + ReLU (scale already folded into the weights).
    y = jnp.maximum(y + c_ref[...], 0.0)
    o_ref[0, :, :] = y.astype(o_ref.dtype)


# ----------------------------------------------------------------------------
# Wrapper: layout prep (once), pallas_call, post-slice
# ----------------------------------------------------------------------------
def atrous_conv_bn_relu(x_nchw, weight, conv_bias, gamma, beta,
                        running_mean, running_var,
                        *, stride=1, padding=0, dilation=1, eps=1e-3,
                        out_dtype=jnp.float32):
    N, Cin, H, W = x_nchw.shape
    Cout, wc_in, kh, kw = weight.shape
    assert wc_in == Cin

    # PyTorch conv output sizes.
    OH = (H + 2 * padding - dilation * (kh - 1) - 1) // stride + 1
    OW = (W + 2 * padding - dilation * (kw - 1) - 1) // stride + 1
    # Dense (stride-1) output sizes; stride>1 handled by subsampling below.
    OH1 = H + 2 * padding - dilation * (kh - 1)
    OW1 = W + 2 * padding - dilation * (kw - 1)
    assert OH1 > 0 and OW1 > 0, "input too small for this kernel/dilation"

    Cinp = _round_up(Cin, 8)
    K = kh * kw * Cinp                      # tap-concatenated contraction depth

    # Per-generation row-tile target: ~3072 matmul rows on 128 MiB VMEM parts
    # (v5e/v6e), ~1024 on 64 MiB parts (v7x).
    try:
        info = pltpu.get_tpu_info()
        vmem_cap = int(getattr(info, "vmem_capacity_bytes", 64 << 20))
    except Exception:  # conservative fallback if introspection is unavailable
        vmem_cap = 64 << 20
    target_rows = 3072 if vmem_cap >= (100 << 20) else 1024

    # Row tiling of the dense output; keep TOH*OW1 a multiple of 8 so the
    # output block's second-minor dim is sublane-aligned.
    lane_unit = 8 // math.gcd(OW1, 8)
    TOH = max(1, min(OH1, max(1, target_rows // OW1)))
    TOH = max(lane_unit, (TOH // lane_unit) * lane_unit)
    n_rt = pl.cdiv(OH1, TOH)
    OHp = n_rt * TOH

    Hp = OHp + dilation * (kh - 1)          # padded-input rows the kernel may touch
    Wp = W + 2 * padding

    # NCHW -> NHWC; one pad op does conv padding + ragged-row-tile padding +
    # channel padding; cast to bf16 for the MXU (halves activation DMA bytes).
    x = jnp.transpose(x_nchw, (0, 2, 3, 1))
    x = jnp.pad(x, ((0, 0),
                    (padding, Hp - H - padding),
                    (padding, padding),
                    (0, Cinp - Cin)))
    x = x.astype(jnp.bfloat16)

    # Fold eval-mode BatchNorm (+ conv bias): scale goes into the weights,
    # shift stays as an f32 epilogue add.
    scale = gamma / jnp.sqrt(running_var + eps)
    shift = beta + scale * (conv_bias - running_mean)

    # (Cout, Cin, kh, kw) -> (kh*kw*Cinp, Cout) bf16, BN-scale folded, done once.
    wmat = jnp.transpose(weight, (2, 3, 1, 0))                  # (kh, kw, Cin, Cout)
    wmat = jnp.pad(wmat, ((0, 0), (0, 0), (0, Cinp - Cin), (0, 0)))
    wmat = wmat.reshape(K, Cout) * scale[None, :]
    wmat = wmat.astype(jnp.bfloat16)
    c = shift.reshape(1, Cout).astype(jnp.float32)

    kernel = functools.partial(_atrous_conv_bn_relu_kernel,
                               kh=kh, kw=kw, dil=dilation,
                               toh=TOH, ow=OW1, cinp=Cinp)

    # Explicit scoped-VMEM limit derived from the actual buffer budget
    # ((8,128)-padded sizes, x2 for double buffering, + in-register A slab).
    def _vmem_est(shape, itemsize):
        s = list(shape)
        s[-1] = _round_up(s[-1], 128)
        if len(s) >= 2:
            s[-2] = _round_up(s[-2], 8)
        n = 1
        for d in s:
            n *= d
        return n * itemsize

    out_isz = jnp.dtype(out_dtype).itemsize
    vmem_need = 2 * (_vmem_est((1, Hp, Wp, Cinp), 2)
                     + _vmem_est((K, Cout), 2)
                     + _vmem_est((1, Cout), 4)
                     + _vmem_est((1, TOH * OW1, Cout), out_isz))
    vmem_need += 2 * (_vmem_est((TOH * OW1, K), 2)
                      + _vmem_est((TOH * OW1, Cout), 4))
    vmem_limit = int(min(max(32 << 20, 2 * vmem_need),
                         int(vmem_cap * 0.9)))

    out = pl.pallas_call(
        kernel,
        out_shape=jax.ShapeDtypeStruct((N, OHp * OW1, Cout), out_dtype),
        grid_spec=pltpu.PrefetchScalarGridSpec(
            num_scalar_prefetch=0,
            grid=(N, n_rt),
            in_specs=[
                # Whole padded image per batch element (same block across t,
                # so it is fetched once per image).  TODO(synk): halo tiling.
                pl.BlockSpec((1, Hp, Wp, Cinp), lambda n, t: (n, 0, 0, 0)),
                pl.BlockSpec((K, Cout), lambda n, t: (0, 0)),
                pl.BlockSpec((1, Cout), lambda n, t: (0, 0)),
            ],
            out_specs=pl.BlockSpec((1, TOH * OW1, Cout),
                                   lambda n, t: (n, t, 0)),
        ),
        compiler_params=pltpu.CompilerParams(
            # t is "arbitrary": with whole-image blocks, splitting t across
            # TensorCores would duplicate activation HBM reads.
            dimension_semantics=("parallel", "arbitrary"),
            vmem_limit_bytes=vmem_limit),
    )(x, wmat, c)

    out = out.reshape(N, OHp, OW1, Cout)[:, :OH1, :, :]
    if stride > 1:
        # TODO(synk): stride>1 reuses the dense stride-1 result and subsamples.
        out = out[:, ::stride, ::stride, :]
    out = out[:, :OH, :OW, :]
    return jnp.transpose(out, (0, 3, 1, 2))   # NHWC -> NCHW


# ----------------------------------------------------------------------------
# Pure-JAX reference (eval-mode BN) for the correctness check
# ----------------------------------------------------------------------------
def _reference_conv_bn_relu(x, w, b, gamma, beta, rmean, rvar,
                            *, stride, padding, dilation, eps):
    y = jax.lax.conv_general_dilated(
        x, w, window_strides=(stride, stride),
        padding=((padding, padding), (padding, padding)),
        rhs_dilation=(dilation, dilation),
        dimension_numbers=('NCHW', 'OIHW', 'NCHW'))
    y = y + b[None, :, None, None]
    y = (y - rmean[None, :, None, None]) / jnp.sqrt(rvar[None, :, None, None] + eps)
    y = y * gamma[None, :, None, None] + beta[None, :, None, None]
    return jnp.maximum(y, 0.0)


if __name__ == "__main__":
    key = jax.random.PRNGKey(0)
    keys = jax.random.split(key, 7)

    # Small deterministic config: atrous (dilated) 3x3 conv, stride 1.
    N, Cin, H, W = 2, 4, 16, 16
    Cout, ksize = 32, 3
    stride, padding, dilation, eps = 1, 2, 2, 1e-3   # eps per nn.BatchNorm2d(eps=0.001)

    x = jax.random.normal(keys[0], (N, Cin, H, W), jnp.float32)
    w = jax.random.normal(keys[1], (Cout, Cin, ksize, ksize), jnp.float32) * (
        2.0 / (Cin * ksize * ksize)) ** 0.5
    b = 0.05 * jax.random.normal(keys[2], (Cout,), jnp.float32)
    gamma = 1.0 + 0.1 * jax.random.normal(keys[3], (Cout,), jnp.float32)
    beta = 0.05 * jax.random.normal(keys[4], (Cout,), jnp.float32)
    r_mean = 0.05 * jax.random.normal(keys[5], (Cout,), jnp.float32)
    r_var = 1.0 + 0.1 * jax.random.uniform(keys[6], (Cout,), jnp.float32)

    out = atrous_conv_bn_relu(x, w, b, gamma, beta, r_mean, r_var,
                              stride=stride, padding=padding,
                              dilation=dilation, eps=eps)
    out = jax.block_until_ready(out)

    assert out.shape == (N, Cout, 16, 16), out.shape
    assert bool(jnp.all(jnp.isfinite(out)))

    ref = _reference_conv_bn_relu(x, w, b, gamma, beta, r_mean, r_var,
                                  stride=stride, padding=padding,
                                  dilation=dilation, eps=eps)
    # Tightened mixed abs/rel check (bf16 operands -> ~1e-2 scale differences).
    err = float(jnp.max(jnp.abs(out - ref) / (1.0 + jnp.abs(ref))))
    assert err < 5e-2, f"normalized max error vs reference: {err}"

    print("KERNEL_OK")
</pallas_src>

<mosaic_0001>
module attributes {stable_mosaic.version = 11 : i64} {
  func.func @_atrous_conv_bn_relu_kernel(%arg0: i32, %arg1: i32, %arg2: memref<1x20x20x8xbf16, #tpu.memory_space<vmem>>, %arg3: memref<72x32xbf16, #tpu.memory_space<vmem>>, %arg4: memref<1x32xf32, #tpu.memory_space<vmem>>, %arg5: memref<1x256x32xf32, #tpu.memory_space<vmem>>) attributes {dimension_semantics = [#tpu.dimension_semantics<parallel>, #tpu.dimension_semantics<arbitrary>], iteration_bounds = array<i64: 2, 1>, scalar_prefetch = 0 : i64, scratch_operands = 0 : i64, tpu.core_type = #tpu.core_type<tc>, window_params = [{transform_indices = @transform_0, window_bounds = array<i64: 1, 20, 20, 8>}, {pipeline_mode = #tpu.pipeline_mode<synchronous>, transform_indices = @transform_1, window_bounds = array<i64: 72, 32>}, {pipeline_mode = #tpu.pipeline_mode<synchronous>, transform_indices = @transform_2, window_bounds = array<i64: 1, 32>}, {transform_indices = @transform_3, window_bounds = array<i64: 1, 256, 32>}]} {
    %c16_i32 = arith.constant 16 : i32
    %0 = arith.muli %arg1, %c16_i32 : i32
    %1 = tpu.assume_multiple %0, 16 : i32
    %c0_i32 = arith.constant 0 : i32
    %2 = arith.addi %1, %c0_i32 : i32
    %c0 = arith.constant 0 : index
    %3 = arith.index_cast %2 : i32 to index
    %c0_0 = arith.constant 0 : index
    %c0_1 = arith.constant 0 : index
    %4 = vector.load %arg2[%c0, %3, %c0_0, %c0_1] : memref<1x20x20x8xbf16, #tpu.memory_space<vmem>>, vector<1x16x16x8xbf16>
    %5 = vector.shape_cast %4 : vector<1x16x16x8xbf16> to vector<16x16x8xbf16>
    %6 = vector.shape_cast %5 : vector<16x16x8xbf16> to vector<256x8xbf16>
    %c0_i32_2 = arith.constant 0 : i32
    %7 = arith.addi %1, %c0_i32_2 : i32
    %c0_3 = arith.constant 0 : index
    %8 = arith.index_cast %7 : i32 to index
    %c2 = arith.constant 2 : index
    %c0_4 = arith.constant 0 : index
    %9 = vector.load %arg2[%c0_3, %8, %c2, %c0_4] : memref<1x20x20x8xbf16, #tpu.memory_space<vmem>>, vector<1x16x16x8xbf16>
    %10 = vector.shape_cast %9 : vector<1x16x16x8xbf16> to vector<16x16x8xbf16>
    %11 = vector.shape_cast %10 : vector<16x16x8xbf16> to vector<256x8xbf16>
    %c0_i32_5 = arith.constant 0 : i32
    %12 = arith.addi %1, %c0_i32_5 : i32
    %c0_6 = arith.constant 0 : index
    %13 = arith.index_cast %12 : i32 to index
    %c4 = arith.constant 4 : index
    %c0_7 = arith.constant 0 : index
    %14 = vector.load %arg2[%c0_6, %13, %c4, %c0_7] : memref<1x20x20x8xbf16, #tpu.memory_space<vmem>>, vector<1x16x16x8xbf16>
    %15 = vector.shape_cast %14 : vector<1x16x16x8xbf16> to vector<16x16x8xbf16>
    %16 = vector.shape_cast %15 : vector<16x16x8xbf16> to vector<256x8xbf16>
    %c2_i32 = arith.constant 2 : i32
    %17 = arith.addi %1, %c2_i32 : i32
    %c0_8 = arith.constant 0 : index
    %18 = arith.index_cast %17 : i32 to index
    %c0_9 = arith.constant 0 : index
    %c0_10 = arith.constant 0 : index
    %19 = vector.load %arg2[%c0_8, %18, %c0_9, %c0_10] : memref<1x20x20x8xbf16, #tpu.memory_space<vmem>>, vector<1x16x16x8xbf16>
    %20 = vector.shape_cast %19 : vector<1x16x16x8xbf16> to vector<16x16x8xbf16>
    %21 = vector.shape_cast %20 : vector<16x16x8xbf16> to vector<256x8xbf16>
    %c2_i32_11 = arith.constant 2 : i32
    %22 = arith.addi %1, %c2_i32_11 : i32
    %c0_12 = arith.constant 0 : index
    %23 = arith.index_cast %22 : i32 to index
    %c2_13 = arith.constant 2 : index
    %c0_14 = arith.constant 0 : index
    %24 = vector.load %arg2[%c0_12, %23, %c2_13, %c0_14] : memref<1x20x20x8xbf16, #tpu.memory_space<vmem>>, vector<1x16x16x8xbf16>
    %25 = vector.shape_cast %24 : vector<1x16x16x8xbf16> to vector<16x16x8xbf16>
    %26 = vector.shape_cast %25 : vector<16x16x8xbf16> to vector<256x8xbf16>
    %c2_i32_15 = arith.constant 2 : i32
    %27 = arith.addi %1, %c2_i32_15 : i32
    %c0_16 = arith.constant 0 : index
    %28 = arith.index_cast %27 : i32 to index
    %c4_17 = arith.constant 4 : index
    %c0_18 = arith.constant 0 : index
    %29 = vector.load %arg2[%c0_16, %28, %c4_17, %c0_18] : memref<1x20x20x8xbf16, #tpu.memory_space<vmem>>, vector<1x16x16x8xbf16>
    %30 = vector.shape_cast %29 : vector<1x16x16x8xbf16> to vector<16x16x8xbf16>
    %31 = vector.shape_cast %30 : vector<16x16x8xbf16> to vector<256x8xbf16>
    %c4_i32 = arith.constant 4 : i32
    %32 = arith.addi %1, %c4_i32 : i32
    %c0_19 = arith.constant 0 : index
    %33 = arith.index_cast %32 : i32 to index
    %c0_20 = arith.constant 0 : index
    %c0_21 = arith.constant 0 : index
    %34 = vector.load %arg2[%c0_19, %33, %c0_20, %c0_21] : memref<1x20x20x8xbf16, #tpu.memory_space<vmem>>, vector<1x16x16x8xbf16>
    %35 = vector.shape_cast %34 : vector<1x16x16x8xbf16> to vector<16x16x8xbf16>
    %36 = vector.shape_cast %35 : vector<16x16x8xbf16> to vector<256x8xbf16>
    %c4_i32_22 = arith.constant 4 : i32
    %37 = arith.addi %1, %c4_i32_22 : i32
    %c0_23 = arith.constant 0 : index
    %38 = arith.index_cast %37 : i32 to index
    %c2_24 = arith.constant 2 : index
    %c0_25 = arith.constant 0 : index
    %39 = vector.load %arg2[%c0_23, %38, %c2_24, %c0_25] : memref<1x20x20x8xbf16, #tpu.memory_space<vmem>>, vector<1x16x16x8xbf16>
    %40 = vector.shape_cast %39 : vector<1x16x16x8xbf16> to vector<16x16x8xbf16>
    %41 = vector.shape_cast %40 : vector<16x16x8xbf16> to vector<256x8xbf16>
    %c4_i32_26 = arith.constant 4 : i32
    %42 = arith.addi %1, %c4_i32_26 : i32
    %c0_27 = arith.constant 0 : index
    %43 = arith.index_cast %42 : i32 to index
    %c4_28 = arith.constant 4 : index
    %c0_29 = arith.constant 0 : index
    %44 = vector.load %arg2[%c0_27, %43, %c4_28, %c0_29] : memref<1x20x20x8xbf16, #tpu.memory_space<vmem>>, vector<1x16x16x8xbf16>
    %45 = vector.shape_cast %44 : vector<1x16x16x8xbf16> to vector<16x16x8xbf16>
    %46 = vector.shape_cast %45 : vector<16x16x8xbf16> to vector<256x8xbf16>
    %47 = tpu.concatenate %6, %11, %16, %21, %26, %31, %36, %41, %46 in 1 : vector<256x8xbf16>, vector<256x8xbf16>, vector<256x8xbf16>, vector<256x8xbf16>, vector<256x8xbf16>, vector<256x8xbf16>, vector<256x8xbf16>, vector<256x8xbf16>, vector<256x8xbf16> -> vector<256x72xbf16>
    %c0_30 = arith.constant 0 : index
    %c0_31 = arith.constant 0 : index
    %48 = vector.load %arg3[%c0_30, %c0_31] : memref<72x32xbf16, #tpu.memory_space<vmem>>, vector<72x32xbf16>
    %cst = arith.constant dense<0.000000e+00> : vector<256x32xf32>
    %49 = tpu.matmul %47, %48, %cst {dimension_numbers = #tpu.dot_dimension_numbers<[1], [0], [0], [1], [0, 0, 1, 1], [], []>} : vector<256x72xbf16>, vector<72x32xbf16>, vector<256x32xf32> -> vector<256x32xf32>
    %c0_32 = arith.constant 0 : index
    %c0_33 = arith.constant 0 : index
    %50 = vector.load %arg4[%c0_32, %c0_33] : memref<1x32xf32, #tpu.memory_space<vmem>>, vector<1x32xf32>
    %51 = vector.broadcast %50 : vector<1x32xf32> to vector<256x32xf32>
    %52 = arith.addf %49, %51 : vector<256x32xf32>
    %cst_34 = arith.constant 0.000000e+00 : f32
    %53 = vector.broadcast %cst_34 : f32 to vector<256x32xf32>
    %54 = arith.maximumf %52, %53 : vector<256x32xf32>
    %c0_35 = arith.constant 0 : index
    %c0_36 = arith.constant 0 : index
    %c0_37 = arith.constant 0 : index
    %55 = vector.load %arg5[%c0_35, %c0_36, %c0_37] : memref<1x256x32xf32, #tpu.memory_space<vmem>>, vector<1x256x32xf32>
    %56 = vector.shape_cast %55 : vector<1x256x32xf32> to vector<256x32xf32>
    %57 = vector.shape_cast %54 : vector<256x32xf32> to vector<1x256x32xf32>
    tpu.vector_store %arg5[%c0_35, %c0_36, %c0_37], %57 {strides = array<i32>} : memref<1x256x32xf32, #tpu.memory_space<vmem>>, vector<1x256x32xf32>,
    return
  }
  func.func @transform_0(%arg0: i32, %arg1: i32) -> (i32, i32, i32, i32) {
    %c0_i32 = arith.constant 0 : i32
    %c0_i32_0 = arith.constant 0 : i32
    %c0_i32_1 = arith.constant 0 : i32
    %c0_i32_2 = arith.constant 0 : i32
    return %arg0, %c0_i32, %c0_i32_0, %c0_i32_1 : i32, i32, i32, i32
  }
  func.func @transform_1(%arg0: i32, %arg1: i32) -> (i32, i32) {
    %c0_i32 = arith.constant 0 : i32
    %c0_i32_0 = arith.constant 0 : i32
    %c0_i32_1 = arith.constant 0 : i32
    return %c0_i32, %c0_i32_0 : i32, i32
  }
  func.func @transform_2(%arg0: i32, %arg1: i32) -> (i32, i32) {
    %c0_i32 = arith.constant 0 : i32
    %c0_i32_0 = arith.constant 0 : i32
    %c0_i32_1 = arith.constant 0 : i32
    return %c0_i32, %c0_i32_0 : i32, i32
  }
  func.func @transform_3(%arg0: i32, %arg1: i32) -> (i32, i32, i32) {
    %c0_i32 = arith.constant 0 : i32
    %c0_i32_0 = arith.constant 0 : i32
    return %arg0, %arg1, %c0_i32 : i32, i32, i32
  }
}

</mosaic_0001>

<bundles_post_ra>
// kernel: tpu_custom_call.1
= control target key start
LH: loop header
LB: loop body
LE: loop exit
PB: predicated region body
PF: predicated region fallthrough
CT: control target
= control target key end

     0   :  { %s3516_s12 = smov 0   ;;  %s3518_s13 = smov 0   ;;  %s5191_s0 = inlined_call_operand.vmem [shape: bf16[2,20,20,8], index: 0, kind: input, shape index: {}]   ;;  %s5192_s1 = inlined_call_operand.vmem [shape: bf16[72,32], index: 1, kind: input, shape index: {}]   ;;  %s5193_s2 = inlined_call_operand.vmem [shape: f32[1,32], index: 2, kind: input, shape index: {}]   ;;  %s5194_s3 = inlined_call_operand.vmem [shape: f32[2,256,32], index: 3, kind: output, shape index: {}]  }
   0x1   :  { %s3520_s14 = smov 0  }
   0x2 LB: > { %s25_s15 = sadd.s32 1, %s3482_s13  ;;  %p2829_p0 = scmp.ge.s32.totalorder %s3486_s14, 1  ;;  %s3486_s14 = sphi %s3520_s14, %s13_s14   ;;  %s3482_s13 = sphi %s3518_s13, %s5234_s13   ;;  %s3478_s12 = sphi %s3516_s12, %s5233_s12  }
   0x3   : > { %p27_p1 = scmp.ge.s32.totalorder %s25_s15, 2  ;;  %p151_p2 = scmp.lt.s32.totalorder %s3486_s14, 3 }
   0x5   : > { %s5236_s15 = smov (%p27_p1, %s25_s15), 0  ;;  %p152_p3 = pnand %p2829_p0, %p151_p2 }
   0x7   : > { %155 = sbr.rel (%p152_p3) target bundleno = 601 (0x259), region = 32 }
   0xc   : > { %p179_p4 = scmp.lt.s32.totalorder %s3478_s12, 1  ;;  %vm311_vm0 = vcmask 1042432   ;;  %vm312_vm1 = vcmask 1046532   ;;  %vm490_vm3 = vcmask 1041408   ;;  %vm491_vm4 = vcmask 1045508   ;;  %s3488_s20 = smov 8  }
   0xd   : > { %vm3542_vm2 = vmor %vm311_vm0, %vm312_vm1  ;;  %s3489_s21 = smov 16   ;;  %s3490_s22 = smov 24   ;;  %vm2505_vm6 = vcmask 1043456   ;;  %vm2149_vm7 = vcmask 64512   ;;  %vm2198_vm8 = vcmask 130048   ;;  %vm2231_vm9 = vcmask 195584  }
   0xe   : > { %s5238_s12 = smov (!%p179_p4, %s3478_s12), 1  ;;  %vm3576_vm5 = vmor %vm490_vm3, %vm491_vm4  ;;  %s3491_s23 = smov 32   ;;  %vm2264_vm10 = vcmask 261120   ;;  %vm2297_vm11 = vcmask 326656   ;;  %vm2330_vm12 = vcmask 392192   ;;  %vm2363_vm13 = vcmask 457728  }
   0xf   : > { %s3365_s16 = smul.u32 240, %s5238_s12  ;;  %s3492_s24 = smov 40   ;;  %vm2396_vm14 = vcmask 523264   ;;  %vm2472_vm15 = vcmask 588800  }
  0x10   : > { %s3493_s25 = smov 48   ;;  %s3494_s26 = smov 56  }
  0x11   : > { %s3540_s19 = scalar_lea.vmem %s5191_s0, %s3365_s16  ;;  %s3495_s27 = smov 64  }
  0x12   : > { %v3547_v1 = vld [vmem:[%s3540_s19 + $0x10] sm:$0xf]  ;;  %v233_v2 = vld [vmem:[%s3540_s19 + $0xc] sm:$0xe]  ;;  %v234_v3 = vld [vmem:[%s3540_s19 + $0x14] sm:$0x1] }
  0x13   : > { %v2834_v4 = vrot.slane %v233_v2, 9  ;;  %v323_v5 = vrot.slane %v3547_v1, 5  ;;  %v326_v6 = vrot.slane %v234_v3, 5  ;;  %v200_v7 = vld [vmem:[%s3540_s19 + $0x4] sm:$0xf]  ;;  %v502_v8 = vrot.slane %v3547_v1, 6 }
  0x14   : > { %v231_v9 = vld [vmem:[%s3540_s19] sm:$0xe]  ;;  %v232_v10 = vld [vmem:[%s3540_s19 + $0x8] sm:$0x1]  ;;  %v316_v11 = vrot.slane %v200_v7, 5  ;;  %v495_v12 = vrot.slane %v200_v7, 6 }
  0x15   : > { %v324_v13 = vsel %vm3542_vm2, %v2834_v4, %v323_v5  ;;  %v325_v14 = vrot.slane %v323_v5, 4  ;;  %v2833_v15 = vrot.slane %v231_v9, 9  ;;  %v319_v16 = vrot.slane %v232_v10, 5  ;;  %v218_v17 = vld [vmem:[%s3540_s19 + $0x70] sm:$0xf]  ;;  %s3289_s17 = sshll.u32 %s5238_s12, 8 }
  0x16   : > { %v318_v18 = vrot.slane %v316_v11, 4  ;;  %v249_v19 = vld [vmem:[%s3540_s19 + $0x6c] sm:$0xe]  ;;  %v250_v20 = vld [vmem:[%s3540_s19 + $0x74] sm:$0x1]  ;;  %v379_v21 = vrot.slane %v218_v17, 5 }
  0x17   : > { %v327_v22 = vsel %vm3542_vm2, %v325_v14, %v326_v6  ;;  %v317_v23 = vsel %vm3542_vm2, %v2833_v15, %v316_v11  ;;  %v2842_v24 = vrot.slane %v249_v19, 9  ;;  %v382_v25 = vrot.slane %v250_v20, 5  ;;  %v216_v26 = vld [vmem:[%s3540_s19 + $0x64] sm:$0xf]  ;;  %v247_v27 = vld [vmem:[%s3540_s19 + $0x60] sm:$0xe] }
  0x18   : > { %v3138_v28 = vcombine.low %v324_v13, %v327_v22  ;;  %v320_v29 = vsel %vm3542_vm2, %v318_v18, %v319_v16  ;;  %v381_v30 = vrot.slane %v379_v21, 4  ;;  %v248_v31 = vld [vmem:[%s3540_s19 + $0x68] sm:$0x1]  ;;  %v2841_v32 = vrot.slane %v247_v27, 9  ;;  %v442_v33 = vld [vmem:[%s3540_s19 + $0x60] sm:$0xc] }
  0x19   : > { %v3137_v34 = vcombine.low %v317_v23, %v320_v29  ;;  %v380_v35 = vsel %vm3542_vm2, %v2842_v24, %v379_v21  ;;  %v372_v36 = vrot.slane %v216_v26, 5  ;;  %v375_v37 = vrot.slane %v248_v31, 5  ;;  %v443_v38 = vld [vmem:[%s3540_s19 + $0x68] sm:$0x3]  ;;  %v426_v40 = vld [vmem:[%s3540_s19] sm:$0xc] }
  0x1a   : > { %1527 = vrot.lane.b32.xlu1 %v3138_v28, %s3488_s20  ;;  %v383_v41 = vsel %vm3542_vm2, %v381_v30, %v382_v25  ;;  %v2857_v42 = vrot.slane %v442_v33, 10  ;;  %v551_v43 = vrot.slane %v216_v26, 6  ;;  %v554_v44 = vrot.slane %v443_v38, 6  ;;  %v427_v45 = vld [vmem:[%s3540_s19 + $0x8] sm:$0x3] }
  0x1b   : > { %1525 = vrot.lane.b32.xlu0 %v3137_v34, %s3488_s20  ;;  %v3146_v46 = vcombine.low %v380_v35, %v383_v41  ;;  %v373_v47 = vsel %vm3542_vm2, %v2841_v32, %v372_v36  ;;  %v374_v48 = vrot.slane %v372_v36, 4  ;;  %v2849_v49 = vrot.slane %v426_v40, 10  ;;  %v444_v50 = vld [vmem:[%s3540_s19 + $0x6c] sm:$0xc]  ;;  %v445_v51 = vld [vmem:[%s3540_s19 + $0x74] sm:$0x3] }
  0x1c   : > { %v552_v52 = vsel %vm3576_vm5, %v2857_v42, %v551_v43  ;;  %v553_v53 = vrot.slane %v551_v43, 4  ;;  %v497_v54 = vrot.slane %v495_v12, 4  ;;  %v498_v55 = vrot.slane %v427_v45, 6  ;;  %v428_v60 = vld [vmem:[%s3540_s19 + $0xc] sm:$0xc] }
  0x1d   : > { %v376_v56 = vsel %vm3542_vm2, %v374_v48, %v375_v37  ;;  %v496_v57 = vsel %vm3576_vm5, %v2849_v49, %v495_v12  ;;  %v2858_v58 = vrot.slane %v444_v50, 10  ;;  %v558_v59 = vrot.slane %v218_v17, 6  ;;  %v429_v61 = vld [vmem:[%s3540_s19 + $0x14] sm:$0x3]  ;;  %v3618_v16 = vld [vmem:[%s3540_s19 + $0x7c] sm:$0xf] }
  0x1e   : > { %1543 = vrot.lane.b32.xlu1 %v3146_v46, %s3488_s20  ;;  %v3145_v62 = vcombine.low %v373_v47, %v376_v56  ;;  %v555_v63 = vsel %vm3576_vm5, %v553_v53, %v554_v44  ;;  %v499_v2 = vsel %vm3576_vm5, %v497_v54, %v498_v55  ;;  %v561_v3 = vrot.slane %v445_v51, 6  ;;  %v2881_v17 = vld [vmem:[%s3540_s19 + $0x78] sm:$0xf]  ;;  %v3624_v20 = vld [vmem:[%s3540_s19 + $0x1c] sm:$0xf] }
  0x1f   : > { %v3161_v4 = vcombine.low %v552_v52, %v555_v63  ;;  %v559_v5 = vsel %vm3576_vm5, %v2858_v58, %v558_v59  ;;  %v560_v6 = vrot.slane %v558_v59, 4  ;;  %v3153_v7 = vcombine.low %v496_v57, %v499_v2  ;;  %v2913_v1 = vld [vmem:[%s3540_s19 + $0x78] sm:$0xe]  ;;  %v2914_v21 = vld [vmem:[%s3540_s19 + $0x80] sm:$0x1] }
  0x20   : > { %1541 = vrot.lane.b32.xlu0 %v3145_v62, %s3488_s20  ;;  %v2850_v9 = vrot.slane %v428_v60, 10  ;;  %v504_v10 = vrot.slane %v502_v8, 4  ;;  %v505_v11 = vrot.slane %v429_v61, 6  ;;  %v779_v18 = vrot.slane %v3618_v16, 5  ;;  %v2897_v23 = vld [vmem:[%s3540_s19 + $0x18] sm:$0xe] }
  0x21   : > { %v562_v12 = vsel %vm3576_vm5, %v560_v6, %v561_v3  ;;  %v723_v22 = vrot.slane %v3624_v20, 5  ;;  %v3177_v24 = vcombine.low %v2881_v17, %v3618_v16  ;;  %v2883_v25 = vld [vmem:[%s3540_s19 + $0x84] sm:$0xf]  ;;  %v3635_v26 = vld [vmem:[%s3540_s19 + $0x88] sm:$0xf]  ;;  %v2937_v29 = vrot.slane %v2913_v1, 9 }
  0x22   : > { %1621 = vrot.lane.b32.xlu1 %v3161_v4, %s3489_s21  ;;  %v3162_v13 = vcombine.low %v559_v5, %v562_v12  ;;  %v503_v14 = vsel %vm3576_vm5, %v2850_v9, %v502_v8  ;;  %v506_v15 = vsel %vm3576_vm5, %v504_v10, %v505_v11  ;;  %v2865_v8 = vld [vmem:[%s3540_s19 + $0x18] sm:$0xf]  ;;  %v2898_v27 = vld [vmem:[%s3540_s19 + $0x20] sm:$0x1]  ;;  %v786_v28 = vrot.slane %v3635_v26, 5 }
  0x23   : > { %v3154_v19 = vcombine.low %v503_v14, %v506_v15  ;;  %v781_v30 = vrot.slane %v779_v18, 4  ;;  %v782_v31 = vrot.slane %v2914_v21, 5  ;;  %v2915_v32 = vld [vmem:[%s3540_s19 + $0x84] sm:$0xe]  ;;  %v3169_v33 = vcombine.low %v2865_v8, %v3624_v20  ;;  %v3643_v34 = vld [vmem:[%s3540_s19 + $0x28] sm:$0xf] }
  0x24   : > { %1605 = vrot.lane.b32.xlu0 %v3153_v7, %s3489_s21  ;;  %v2929_v35 = vrot.slane %v2897_v23, 9  ;;  %v2916_v36 = vld [vmem:[%s3540_s19 + $0x8c] sm:$0x1]  ;;  %v2867_v37 = vld [vmem:[%s3540_s19 + $0x24] sm:$0xf]  ;;  %v730_v38 = vrot.slane %v3643_v34, 5  ;;  %v3178_v43 = vcombine.low %v2883_v25, %v3635_v26  ;;  %v780_v47 = vsel %vm3542_vm2, %v2937_v29, %v779_v18 }
  0x25   : > { %v725_v40 = vrot.slane %v723_v22, 4  ;;  %v726_v41 = vrot.slane %v2898_v27, 5  ;;  %v955_v42 = vrot.slane %v3618_v16, 6  ;;  %v2938_v44 = vrot.slane %v2915_v32, 9  ;;  %v2899_v45 = vld [vmem:[%s3540_s19 + $0x24] sm:$0xe] }
  0x26   : > { %1623 = vrot.lane.b32.xlu1 %v3162_v13, %s3489_s21  ;;  %v2900_v46 = vld [vmem:[%s3540_s19 + $0x2c] sm:$0x1]  ;;  %v783_v48 = vsel %vm3542_vm2, %v781_v30, %v782_v31  ;;  %v788_v49 = vrot.slane %v786_v28, 4  ;;  %v789_v50 = vrot.slane %v2916_v36, 5  ;;  %v2961_v51 = vld [vmem:[%s3540_s19 + $0x78] sm:$0xc]  ;;  %v3170_v53 = vcombine.low %v2867_v37, %v3643_v34 }
  0x27   : > { %v899_v52 = vrot.slane %v3624_v20, 6  ;;  %v724_v54 = vsel %vm3542_vm2, %v2929_v35, %v723_v22  ;;  %v2962_v55 = vld [vmem:[%s3540_s19 + $0x80] sm:$0x3]  ;;  %v727_v56 = vsel %vm3542_vm2, %v725_v40, %v726_v41  ;;  %v2930_v57 = vrot.slane %v2899_v45, 9  ;;  %v2945_v60 = vld [vmem:[%s3540_s19 + $0x18] sm:$0xc] }
  0x28   : > { %1607 = vrot.lane.b32.xlu0 %v3154_v19, %s3489_s21  ;;  %v732_v58 = vrot.slane %v730_v38, 4  ;;  %v733_v59 = vrot.slane %v2900_v46, 5  ;;  %v962_v61 = vrot.slane %v3635_v26, 6  ;;  %v3193_v62 = vcombine.low %v780_v47, %v783_v48  ;;  %v2946_v2 = vld [vmem:[%s3540_s19 + $0x20] sm:$0x3] }
  0x29   : > { %v2985_v63 = vrot.slane %v2961_v51, 10  ;;  %v787_v3 = vsel %vm3542_vm2, %v2938_v44, %v786_v28  ;;  %v790_v4 = vsel %vm3542_vm2, %v788_v49, %v789_v50  ;;  %v957_v5 = vrot.slane %v955_v42, 4  ;;  %v2963_v11 = vld [vmem:[%s3540_s19 + $0x84] sm:$0xc]  ;;  %v2964_v12 = vld [vmem:[%s3540_s19 + $0x8c] sm:$0x3] }
  0x2a   : > { %1717 = vrot.lane.b32.xlu1 %v3177_v24, %s3490_s22  ;;  %v958_v6 = vrot.slane %v2962_v55, 6  ;;  %v906_v7 = vrot.slane %v3643_v34, 6  ;;  %v3185_v9 = vcombine.low %v724_v54, %v727_v56  ;;  %v2977_v10 = vrot.slane %v2945_v60, 10  ;;  %v2947_v19 = vld [vmem:[%s3540_s19 + $0x24] sm:$0xc] }
  0x2b   : > { %v731_v13 = vsel %vm3542_vm2, %v2930_v57, %v730_v38  ;;  %v734_v14 = vsel %vm3542_vm2, %v732_v58, %v733_v59  ;;  %v901_v15 = vrot.slane %v899_v52, 4  ;;  %v902_v16 = vrot.slane %v2946_v2, 6  ;;  %v2948_v20 = vld [vmem:[%s3540_s19 + $0x2c] sm:$0x3]  ;;  %v3009_v36 = vld [vmem:[%s3540_s19 + $0x90] sm:$0xf] }
  0x2c   : > { %1701 = vrot.lane.b32.xlu0 %v3169_v33, %s3490_s22  ;;  %v3194_v17 = vcombine.low %v787_v3, %v790_v4  ;;  %v956_v18 = vsel %vm3576_vm5, %v2985_v63, %v955_v42  ;;  %v959_v1 = vsel %vm3576_vm5, %v957_v5, %v958_v6  ;;  %v2986_v21 = vrot.slane %v2963_v11, 10  ;;  %v3707_v37 = vld [vmem:[%s3540_s19 + $0x94] sm:$0xf]  ;;  %v2993_v40 = vld [vmem:[%s3540_s19 + $0x30] sm:$0xf] }
  0x2d   : > { %v964_v8 = vrot.slane %v962_v61, 4  ;;  %v965_v22 = vrot.slane %v2964_v12, 6  ;;  %v3186_v23 = vcombine.low %v731_v13, %v734_v14  ;;  %v900_v24 = vsel %vm3576_vm5, %v2977_v10, %v899_v52  ;;  %v3712_v41 = vld [vmem:[%s3540_s19 + $0x34] sm:$0xf]  ;;  %v3041_v44 = vld [vmem:[%s3540_s19 + $0x90] sm:$0xe] }
  0x2e   : > { %1719 = vrot.lane.b32.xlu1 %v3178_v43, %s3490_s22  ;;  %v903_v25 = vsel %vm3576_vm5, %v901_v15, %v902_v16  ;;  %v2978_v26 = vrot.slane %v2947_v19, 10  ;;  %v908_v27 = vrot.slane %v906_v7, 4  ;;  %v909_v28 = vrot.slane %v2948_v20, 6  ;;  %v3716_v43 = vld [vmem:[%s3540_s19 + $0xa0] sm:$0xf] }
  0x2f   : > { %v3209_v29 = vcombine.low %v956_v18, %v959_v1  ;;  %v963_v30 = vsel %vm3576_vm5, %v2986_v21, %v962_v61  ;;  %v966_v31 = vsel %vm3576_vm5, %v964_v8, %v965_v22  ;;  %v3201_v32 = vcombine.low %v900_v24, %v903_v25  ;;  %v3042_v45 = vld [vmem:[%s3540_s19 + $0x98] sm:$0x1]  ;;  %v3011_v47 = vld [vmem:[%s3540_s19 + $0x9c] sm:$0xf]  ;;  %v3723_v48 = vld [vmem:[%s3540_s19 + $0x40] sm:$0xf] }
  0x30   : > { %1703 = vrot.lane.b32.xlu0 %v3170_v53, %s3490_s22  ;;  %v907_v33 = vsel %vm3576_vm5, %v2978_v26, %v906_v7  ;;  %v910_v34 = vsel %vm3576_vm5, %v908_v27, %v909_v28  ;;  %v3210_v35 = vcombine.low %v963_v30, %v966_v31  ;;  %v1183_v38 = vrot.slane %v3707_v37, 5  ;;  %v3025_v49 = vld [vmem:[%s3540_s19 + $0x30] sm:$0xe]  ;;  %v3026_v52 = vld [vmem:[%s3540_s19 + $0x38] sm:$0x1] }
  0x31   : > { %v3202_v42 = vcombine.low %v907_v33, %v910_v34  ;;  %v1127_v46 = vrot.slane %v3712_v41, 5  ;;  %v3225_v50 = vcombine.low %v3009_v36, %v3707_v37  ;;  %v1190_v51 = vrot.slane %v3716_v43, 5  ;;  %v3043_v53 = vld [vmem:[%s3540_s19 + $0x9c] sm:$0xe]  ;;  %v3044_v57 = vld [vmem:[%s3540_s19 + $0xa4] sm:$0x1] }
  0x32   : > { %1797 = vrot.lane.b32.xlu1 %v3193_v62, %s3491_s23  ;;  %v3065_v54 = vrot.slane %v3041_v44, 9  ;;  %v1185_v55 = vrot.slane %v1183_v38, 4  ;;  %v1186_v56 = vrot.slane %v3042_v45, 5  ;;  %v3217_v58 = vcombine.low %v2993_v40, %v3712_v41  ;;  %v2995_v59 = vld [vmem:[%s3540_s19 + $0x3c] sm:$0xf] }
  0x33   : > { %v1134_v60 = vrot.slane %v3723_v48, 5  ;;  %v3027_v61 = vld [vmem:[%s3540_s19 + $0x3c] sm:$0xe]  ;;  %v3057_v62 = vrot.slane %v3025_v49, 9  ;;  %v1129_v63 = vrot.slane %v1127_v46, 4  ;;  %v1130_v2 = vrot.slane %v3026_v52, 5 }
  0x34   : > { %1781 = vrot.lane.b32.xlu0 %v3185_v9, %s3491_s23  ;;  %v3028_v3 = vld [vmem:[%s3540_s19 + $0x44] sm:$0x1]  ;;  %v3226_v4 = vcombine.low %v3011_v47, %v3716_v43  ;;  %v3066_v5 = vrot.slane %v3043_v53, 9  ;;  %v1192_v6 = vrot.slane %v1190_v51, 4  ;;  %v1193_v7 = vrot.slane %v3044_v57, 5 }
  0x35   : > { %v1359_v9 = vrot.slane %v3707_v37, 6  ;;  %v1184_v10 = vsel %vm3542_vm2, %v3065_v54, %v1183_v38  ;;  %v1187_v11 = vsel %vm3542_vm2, %v1185_v55, %v1186_v56  ;;  %v3089_v12 = vld [vmem:[%s3540_s19 + $0x90] sm:$0xc]  ;;  %v3090_v13 = vld [vmem:[%s3540_s19 + $0x98] sm:$0x3]  ;;  %v3218_v14 = vcombine.low %v2995_v59, %v3723_v48 }
  0x36   : > { %1799 = vrot.lane.b32.xlu1 %v3194_v17, %s3491_s23  ;;  %v3058_v15 = vrot.slane %v3027_v61, 9  ;;  %v1136_v16 = vrot.slane %v1134_v60, 4  ;;  %v1137_v17 = vrot.slane %v3028_v3, 5  ;;  %v3750_v18 = vld [vmem:[%s3540_s19 + $0x7c] sm:$0xf]  ;;  %v1303_v19 = vrot.slane %v3712_v41, 6 }
  0x37   : > { %v1128_v20 = vsel %vm3542_vm2, %v3057_v62, %v1127_v46  ;;  %v1131_v1 = vsel %vm3542_vm2, %v1129_v63, %v1130_v2  ;;  %v3241_v21 = vcombine.low %v1184_v10, %v1187_v11  ;;  %v1191_v8 = vsel %vm3542_vm2, %v3066_v5, %v1190_v51  ;;  %v3074_v24 = vld [vmem:[%s3540_s19 + $0x38] sm:$0x3]  ;;  %v3765_v25 = vld [vmem:[%s3540_s19 + $0x1c] sm:$0xf]  ;;  %v252_v34 = vld [vmem:[%s3540_s19 + $0x80] sm:$0x1] }
  0x38   : > { %1783 = vrot.lane.b32.xlu0 %v3186_v23, %s3491_s23  ;;  %v1194_v22 = vsel %vm3542_vm2, %v1192_v6, %v1193_v7  ;;  %v3073_v23 = vld [vmem:[%s3540_s19 + $0x30] sm:$0xc]  ;;  %v3113_v26 = vrot.slane %v3089_v12, 10  ;;  %v1361_v27 = vrot.slane %v1359_v9, 4  ;;  %v1362_v28 = vrot.slane %v3090_v13, 6 }
  0x39   : > { %v386_v30 = vrot.slane %v3750_v18, 5  ;;  %v3233_v31 = vcombine.low %v1128_v20, %v1131_v1  ;;  %v1138_v33 = vsel %vm3542_vm2, %v1136_v16, %v1137_v17  ;;  %v1305_v36 = vrot.slane %v1303_v19, 4  ;;  %v235_v38 = vld [vmem:[%s3540_s19 + $0x18] sm:$0xe]  ;;  %v236_v45 = vld [vmem:[%s3540_s19 + $0x20] sm:$0x1] }
  0x3a   : > { %1877 = vrot.lane.b32.xlu1 %v3209_v29, %s3492_s24  ;;  %v251_v29 = vld [vmem:[%s3540_s19 + $0x78] sm:$0xe]  ;;  %v1306_v37 = vrot.slane %v3074_v24, 6  ;;  %v330_v40 = vrot.slane %v3765_v25, 5  ;;  %v1366_v41 = vrot.slane %v3716_v43, 6  ;;  %v1360_v46 = vsel %vm3576_vm5, %v3113_v26, %v1359_v9 }
  0x3b   : > { %v2843_v44 = vrot.slane %v251_v29, 9  ;;  %v1363_v47 = vsel %vm3576_vm5, %v1361_v27, %v1362_v28  ;;  %v388_v49 = vrot.slane %v386_v30, 4  ;;  %v3091_v51 = vld [vmem:[%s3540_s19 + $0x9c] sm:$0xc]  ;;  %v1310_v43 = vrot.slane %v3723_v48, 6 }
  0x3c   : > { %1861 = vrot.lane.b32.xlu0 %v3201_v32, %s3492_s24  ;;  %v1135_v32 = vsel %vm3542_vm2, %v3058_v15, %v1134_v60  ;;  %v2835_v53 = vrot.slane %v235_v38, 9  ;;  %v3092_v54 = vld [vmem:[%s3540_s19 + $0xa4] sm:$0x3]  ;;  %v3789_v55 = vld [vmem:[%s3540_s19 + $0x88] sm:$0xf]  ;;  %v1307_v57 = vsel %vm3576_vm5, %v1305_v36, %v1306_v37  ;;  %v333_v59 = vrot.slane %v236_v45, 5 }
  0x3d   : > { %v3234_v52 = vcombine.low %v1135_v32, %v1138_v33  ;;  %v3075_v60 = vld [vmem:[%s3540_s19 + $0x3c] sm:$0xc]  ;;  %v3257_v48 = vcombine.low %v1360_v46, %v1363_v47  ;;  %v387_v61 = vsel %vm3542_vm2, %v2843_v44, %v386_v30  ;;  %v3114_v62 = vrot.slane %v3091_v51, 10  ;;  %v3076_v63 = vld [vmem:[%s3540_s19 + $0x44] sm:$0x3] }
  0x3e   : > { %1879 = vrot.lane.b32.xlu1 %v3210_v35, %s3492_s24  ;;  %v3105_v35 = vrot.slane %v3073_v23, 10  ;;  %v3801_v2 = vld [vmem:[%s3540_s19 + $0x28] sm:$0xf]  ;;  %v1369_v5 = vrot.slane %v3092_v54, 6  ;;  %v253_v6 = vld [vmem:[%s3540_s19 + $0x84] sm:$0xe]  ;;  %v331_v10 = vsel %vm3542_vm2, %v2835_v53, %v330_v40 }
  0x3f   : > { %v393_v7 = vrot.slane %v3789_v55, 5  ;;  %v3106_v11 = vrot.slane %v3075_v60, 10  ;;  %v254_v12 = vld [vmem:[%s3540_s19 + $0x8c] sm:$0x1]  ;;  %v1313_v15 = vrot.slane %v3076_v63, 6  ;;  %v337_v17 = vrot.slane %v3801_v2, 5 }
  0x40   : > { %1863 = vrot.lane.b32.xlu0 %v3202_v42, %s3492_s24  ;;  %v3242_v42 = vcombine.low %v1191_v8, %v1194_v22  ;;  %v1304_v56 = vsel %vm3576_vm5, %v3105_v35, %v1303_v19  ;;  %v237_v16 = vld [vmem:[%s3540_s19 + $0x24] sm:$0xe]  ;;  %v1367_v20 = vsel %vm3576_vm5, %v3114_v62, %v1366_v41  ;;  %v2844_v1 = vrot.slane %v253_v6, 9  ;;  %v446_v24 = vld [vmem:[%s3540_s19 + $0x78] sm:$0xc] }
  0x41   : > { %v3249_v9 = vcombine.low %v1304_v56, %v1307_v57  ;;  %v395_v22 = vrot.slane %v393_v7, 4  ;;  %v396_v23 = vrot.slane %v254_v12, 5  ;;  %v565_v26 = vrot.slane %v3750_v18, 6  ;;  %v447_v30 = vld [vmem:[%s3540_s19 + $0x80] sm:$0x3] }
  0x42   : > { %1973 = vrot.lane.b32.xlu1 %v3225_v50, %s3493_s25  ;;  %v389_v50 = vrot.slane %v252_v34, 5  ;;  %v1311_v28 = vsel %vm3576_vm5, %v3106_v11, %v1310_v43  ;;  %v2836_v29 = vrot.slane %v237_v16, 9  ;;  %v339_v32 = vrot.slane %v337_v17, 4  ;;  %v430_v34 = vld [vmem:[%s3540_s19 + $0x18] sm:$0xc] }
  0x43   : > { %v509_v35 = vrot.slane %v3765_v25, 6  ;;  %v394_v36 = vsel %vm3542_vm2, %v2844_v1, %v393_v7  ;;  %v2859_v37 = vrot.slane %v446_v24, 10  ;;  %v431_v38 = vld [vmem:[%s3540_s19 + $0x20] sm:$0x3]  ;;  %v572_v44 = vrot.slane %v3789_v55, 6 }
  0x44   : > { %1957 = vrot.lane.b32.xlu0 %v3217_v58, %s3493_s25  ;;  %v332_v58 = vrot.slane %v330_v40, 4  ;;  %v390_v3 = vsel %vm3542_vm2, %v388_v49, %v389_v50  ;;  %v397_v40 = vsel %vm3542_vm2, %v395_v22, %v396_v23  ;;  %v338_v45 = vsel %vm3542_vm2, %v2836_v29, %v337_v17  ;;  %v448_v47 = vld [vmem:[%s3540_s19 + $0x84] sm:$0xc]  ;;  %v449_v49 = vld [vmem:[%s3540_s19 + $0x8c] sm:$0x3] }
  0x45   : > { %v3147_v19 = vcombine.low %v387_v61, %v390_v3  ;;  %v2851_v46 = vrot.slane %v430_v34, 10  ;;  %v511_v51 = vrot.slane %v509_v35, 4  ;;  %v3148_v53 = vcombine.low %v394_v36, %v397_v40  ;;  %v432_v55 = vld [vmem:[%s3540_s19 + $0x24] sm:$0xc]  ;;  %v433_v56 = vld [vmem:[%s3540_s19 + $0x2c] sm:$0x3] }
  0x46   : > { %1975 = vrot.lane.b32.xlu1 %v3226_v4, %s3493_s25  ;;  %v1368_v4 = vrot.slane %v1366_v41, 4  ;;  %v334_v13 = vsel %vm3542_vm2, %v332_v58, %v333_v59  ;;  %v567_v41 = vrot.slane %v565_v26, 4  ;;  %v566_v54 = vsel %vm3576_vm5, %v2859_v37, %v565_v26  ;;  %v3870_v12 = vld [vmem:[%s3540_s19 + $0x94] sm:$0xf]  ;;  %v2917_v17 = vld [vmem:[%s3540_s19 + $0x90] sm:$0xe] }
  0x47   : > { %v3139_v27 = vcombine.low %v331_v10, %v334_v13  ;;  %v2860_v58 = vrot.slane %v448_v47, 10  ;;  %v574_v59 = vrot.slane %v572_v44, 4  ;;  %v575_v60 = vrot.slane %v449_v49, 6  ;;  %v2885_v13 = vld [vmem:[%s3540_s19 + $0x90] sm:$0xf] }
  0x48   : > { %1959 = vrot.lane.b32.xlu0 %v3218_v14, %s3493_s25  ;;  %v1312_v14 = vrot.slane %v1310_v43, 4  ;;  %v1370_v8 = vsel %vm3576_vm5, %v1368_v4, %v1369_v5  ;;  %v512_v43 = vrot.slane %v431_v38, 6  ;;  %v510_v61 = vsel %vm3576_vm5, %v2851_v46, %v509_v35  ;;  %v3876_v16 = vld [vmem:[%s3540_s19 + $0x34] sm:$0xf]  ;;  %v2887_v22 = vld [vmem:[%s3540_s19 + $0x9c] sm:$0xf] }
  0x49   : > { %v3258_v18 = vcombine.low %v1367_v20, %v1370_v8  ;;  %v2852_v63 = vrot.slane %v432_v55, 10  ;;  %v519_v3 = vrot.slane %v433_v56, 6  ;;  %v573_v5 = vsel %vm3576_vm5, %v2860_v58, %v572_v44  ;;  %v2869_v20 = vld [vmem:[%s3540_s19 + $0x30] sm:$0xf]  ;;  %v3887_v23 = vld [vmem:[%s3540_s19 + $0xa0] sm:$0xf] }
  0x4a   : > { %2053 = vrot.lane.b32.xlu1 %v3241_v21, %s3494_s26  ;;  %v238_v21 = vld [vmem:[%s3540_s19 + $0x2c] sm:$0x1]  ;;  %v513_v62 = vsel %vm3576_vm5, %v511_v51, %v512_v43  ;;  %v576_v6 = vsel %vm3576_vm5, %v574_v59, %v575_v60  ;;  %v737_v1 = vrot.slane %v3876_v16, 5  ;;  %v3179_v8 = vcombine.low %v2885_v13, %v3870_v12  ;;  %v2902_v24 = vld [vmem:[%s3540_s19 + $0x38] sm:$0x1] }
  0x4b   : > { %v340_v33 = vrot.slane %v238_v21, 5  ;;  %v3155_v7 = vcombine.low %v510_v61, %v513_v62  ;;  %v3164_v11 = vcombine.low %v573_v5, %v576_v6  ;;  %v2901_v21 = vld [vmem:[%s3540_s19 + $0x30] sm:$0xe]  ;;  %v800_v26 = vrot.slane %v3887_v23, 5  ;;  %v2920_v34 = vld [vmem:[%s3540_s19 + $0xa4] sm:$0x1] }
  0x4c   : > { %2037 = vrot.lane.b32.xlu0 %v3233_v31, %s3494_s26  ;;  %v1314_v31 = vsel %vm3576_vm5, %v1312_v14, %v1313_v15  ;;  %v793_v14 = vrot.slane %v3870_v12, 5  ;;  %v2871_v35 = vld [vmem:[%s3540_s19 + $0x3c] sm:$0xf]  ;;  %v739_v36 = vrot.slane %v737_v1, 4  ;;  %v740_v37 = vrot.slane %v2902_v24, 5 }
  0x4d   : > { %v3250_v25 = vcombine.low %v1311_v28, %v1314_v31  ;;  %v341_v50 = vsel %vm3542_vm2, %v339_v32, %v340_v33  ;;  %v3171_v31 = vcombine.low %v2869_v20, %v3876_v16  ;;  %v3895_v32 = vld [vmem:[%s3540_s19 + $0x40] sm:$0xf]  ;;  %v2931_v33 = vrot.slane %v2901_v21, 9  ;;  %v2904_v44 = vld [vmem:[%s3540_s19 + $0x44] sm:$0x1] }
  0x4e   : > { %2055 = vrot.lane.b32.xlu1 %v3242_v42, %s3494_s26  ;;  %v568_v42 = vrot.slane %v447_v30, 6  ;;  %v795_v28 = vrot.slane %v793_v14, 4  ;;  %v2919_v30 = vld [vmem:[%s3540_s19 + $0x9c] sm:$0xe]  ;;  %v969_v38 = vrot.slane %v3870_v12, 6  ;;  %v3180_v40 = vcombine.low %v2887_v22, %v3887_v23 }
  0x4f   : > { %v802_v46 = vrot.slane %v800_v26, 4  ;;  %v803_v47 = vrot.slane %v2920_v34, 5  ;;  %v2965_v49 = vld [vmem:[%s3540_s19 + $0x90] sm:$0xc]  ;;  %v3172_v51 = vcombine.low %v2871_v35, %v3895_v32  ;;  %v738_v43 = vsel %vm3542_vm2, %v2931_v33, %v737_v1  ;;  %v2967_v6 = vld [vmem:[%s3540_s19 + $0x9c] sm:$0xc] }
  0x50   : > { %2039 = vrot.lane.b32.xlu0 %v3234_v52, %s3494_s26  ;;  %v516_v52 = vrot.slane %v3801_v2, 6  ;;  %v569_v57 = vsel %vm3576_vm5, %v567_v41, %v568_v42  ;;  %v2940_v41 = vrot.slane %v2919_v30, 9  ;;  %v2903_v42 = vld [vmem:[%s3540_s19 + $0x3c] sm:$0xe]  ;;  %v747_v56 = vrot.slane %v2904_v44, 5 }
  0x51   : > { %v3163_v4 = vcombine.low %v566_v54, %v569_v57  ;;  %v2932_v54 = vrot.slane %v2903_v42, 9  ;;  %v2949_v57 = vld [vmem:[%s3540_s19 + $0x30] sm:$0xc]  ;;  %v976_v58 = vrot.slane %v3887_v23, 6  ;;  %v2987_v60 = vrot.slane %v2965_v49, 10 }
  0x52   : > { %2133 = vrot.lane.b32.xlu1 %v3257_v48, %s3495_s27  ;;  %v3140_v48 = vcombine.low %v338_v45, %v341_v50  ;;  %v518_v2 = vrot.slane %v516_v52, 4  ;;  %v913_v50 = vrot.slane %v3876_v16, 6  ;;  %v801_v61 = vsel %vm3542_vm2, %v2940_v41, %v800_v26  ;;  %v2952_v16 = vld [vmem:[%s3540_s19 + $0x44] sm:$0x3]  ;;  %v3013_v34 = vld [vmem:[%s3540_s19 + $0xa8] sm:$0xf] }
  0x53   : > { %v804_v62 = vsel %vm3542_vm2, %v802_v46, %v803_v47  ;;  %v2979_v5 = vrot.slane %v2949_v57, 10  ;;  %v978_v20 = vrot.slane %v976_v58, 4  ;;  %v923_v26 = vrot.slane %v2952_v16, 6  ;;  %v3959_v35 = vld [vmem:[%s3540_s19 + $0xac] sm:$0xf] }
  0x54   : > { %2117 = vrot.lane.b32.xlu0 %v3249_v9, %s3495_s27  ;;  %v517_v9 = vsel %vm3576_vm5, %v2852_v63, %v516_v52  ;;  %v520_v10 = vsel %vm3576_vm5, %v518_v2, %v519_v3  ;;  %v2966_v52 = vld [vmem:[%s3540_s19 + $0x98] sm:$0x3]  ;;  %v971_v63 = vrot.slane %v969_v38, 4  ;;  %v920_v3 = vrot.slane %v3895_v32, 6  ;;  %v3045_v41 = vld [vmem:[%s3540_s19 + $0xa8] sm:$0xe] }
  0x55   : > { %v3156_v15 = vcombine.low %v517_v9, %v520_v10  ;;  %v972_v2 = vrot.slane %v2966_v52, 6  ;;  %v3196_v13 = vcombine.low %v801_v61, %v804_v62  ;;  %v3046_v42 = vld [vmem:[%s3540_s19 + $0xb0] sm:$0x1]  ;;  %v3029_v46 = vld [vmem:[%s3540_s19 + $0x48] sm:$0xe]  ;;  %v3227_v47 = vcombine.low %v3013_v34, %v3959_v35 }
  0x56   : > { %1545 = vrot.lane.b32.xlu1 %v3147_v19, %s3488_s20  ;;  %v2918_v19 = vld [vmem:[%s3540_s19 + $0x98] sm:$0x1]  ;;  %v922_v24 = vrot.slane %v920_v3, 4  ;;  %v3067_v52 = vrot.slane %v3045_v41, 9  ;;  %v3422_v62 = vld [vmem:[%s5192_s1 + $0x20] ss:$0 sps:$4 sm:$0xff]  }
  0x57   : > { %v796_v29 = vrot.slane %v2918_v19, 5  ;;  %v2988_v19 = vrot.slane %v2967_v6, 10  ;;  %3363 = vmatprep.subr.msk.bf16.mxu0 %vm2505_vm6, %v3422_v62  ;;  %3364 = vmatprep.subr.msk.bf16.mxu1 %vm2505_vm6, %v3422_v62  ;;  %v239_v41 = vld [vmem:[%s3540_s19 + $0x30] sm:$0xe] }
  0x58   : > { %1529 = vrot.lane.b32.xlu0 %v3139_v27, %s3488_s20  ;;  %v2939_v27 = vrot.slane %v2917_v17, 9  ;;  %v973_v17 = vsel %vm3576_vm5, %v971_v63, %v972_v2 }
  0x59   : > { %v797_v45 = vsel %vm3542_vm2, %v795_v28, %v796_v29  ;;  %v977_v28 = vsel %vm3576_vm5, %v2988_v19, %v976_v58  ;;  %v3031_v58 = vld [vmem:[%s3540_s19 + $0x54] sm:$0xe] }
  0x5a   : > { %2135 = vrot.lane.b32.xlu1 %v3258_v18, %s3495_s27  ;;  %v744_v18 = vrot.slane %v3895_v32, 5  ;;  %v924_v32 = vsel %vm3576_vm5, %v922_v24, %v923_v26  ;;  %v3078_v24 = vld [vmem:[%s3540_s19 + $0x50] sm:$0x3]  ;;  %v4025_v26 = vld [vmem:[%s3540_s19 + $0x34] sm:$0xf] }
  0x5c   : > { %2119 = vrot.lane.b32.xlu0 %v3250_v25, %s3495_s27  ;;  %v794_v25 = vsel %vm3542_vm2, %v2939_v27, %v793_v14  ;;  %v746_v55 = vrot.slane %v744_v18, 4  ;;  %v745_v9 = vsel %vm3542_vm2, %v2932_v54, %v744_v18  ;;  %v970_v14 = vsel %vm3576_vm5, %v2987_v60, %v969_v38 }
  0x5d   : > { %v3195_v59 = vcombine.low %v794_v25, %v797_v45  ;;  %v3211_v27 = vcombine.low %v970_v14, %v973_v17  ;;  %v1197_v18 = vrot.slane %v3959_v35, 5  ;;  %v3015_v25 = vld [vmem:[%s3540_s19 + $0xb4] sm:$0xf]  ;;  %v3975_v45 = vld [vmem:[%s3540_s19 + $0x58] sm:$0xf]  ;;  %v1200_v54 = vrot.slane %v3046_v42, 5 }
  0x5e   : > { %1547 = vrot.lane.b32.xlu1 %v3148_v53, %s3488_s20  ;;  %v741_v53 = vsel %vm3542_vm2, %v739_v36, %v740_v37  ;;  %v748_v10 = vsel %vm3542_vm2, %v746_v55, %v747_v56  ;;  %v2997_v36 = vld [vmem:[%s3540_s19 + $0x48] sm:$0xf]  ;;  %v3964_v37 = vld [vmem:[%s3540_s19 + $0x4c] sm:$0xf]  ;;  %v3048_v55 = vld [vmem:[%s3540_s19 + $0xbc] sm:$0x1] }
  0x5f   : > { %v3188_v21 = vcombine.low %v745_v9, %v748_v10  ;;  %v1141_v44 = vrot.slane %v3964_v37, 5  ;;  %v3219_v56 = vcombine.low %v2997_v36, %v3964_v37  ;;  %v1148_v57 = vrot.slane %v3975_v45, 5  ;;  %v3093_v10 = vld [vmem:[%s3540_s19 + $0xa8] sm:$0xc] }
  0x60   : > { %1531 = vrot.lane.b32.xlu0 %v3140_v48, %s3488_s20  ;;  %v2950_v48 = vld [vmem:[%s3540_s19 + $0x38] sm:$0x3]  ;;  %v3059_v60 = vrot.slane %v3029_v46, 9  ;;  %v1317_v16 = vrot.slane %v3964_v37, 6  ;;  %v344_v42 = vrot.slane %v4025_v26, 5 }
  0x61   : > { %v916_v12 = vrot.slane %v2950_v48, 6  ;;  %v1143_v48 = vrot.slane %v1141_v44, 4 }
  0x62   : > { %1625 = vrot.lane.b32.xlu1 %v3163_v4, %s3489_s21  ;;  %v3187_v4 = vcombine.low %v738_v43, %v741_v53  ;;  %v3047_v43 = vld [vmem:[%s3540_s19 + $0xb4] sm:$0xe]  ;;  %v1199_v53 = vrot.slane %v1197_v18, 4  ;;  %v1142_v17 = vsel %vm3542_vm2, %v3059_v60, %v1141_v44  ;;  %v1319_v37 = vrot.slane %v1317_v16, 4 }
  0x63   : > { %v3068_v2 = vrot.slane %v3047_v43, 9  ;;  %v346_v60 = vrot.slane %v344_v42, 4 }
  0x64   : > { %1609 = vrot.lane.b32.xlu0 %v3155_v7, %s3489_s21  ;;  %v2968_v7 = vld [vmem:[%s3540_s19 + $0xa4] sm:$0x3]  ;;  %v1201_v9 = vsel %vm3542_vm2, %v1199_v53, %v1200_v54 }
  0x65   : > { %v979_v1 = vrot.slane %v2968_v7, 6  ;;  %v1198_v7 = vsel %vm3542_vm2, %v3067_v52, %v1197_v18  ;;  %v3424_v18 = vld [vmem:[%s5192_s1 + $0x10] sm:$0xff]  }
  0x66   : > { %1627 = vrot.lane.b32.xlu1 %v3164_v11, %s3489_s21  ;;  %v915_v11 = vrot.slane %v913_v50, 4  ;;  %v3095_v52 = vld [vmem:[%s3540_s19 + $0xb4] sm:$0xc] }
  0x67   : > { %v980_v29 = vsel %vm3576_vm5, %v978_v20, %v979_v1  ;;  %v3077_v20 = vld [vmem:[%s3540_s19 + $0x48] sm:$0xc]  ;;  %v3423_v1 = vld [vmem:[%s5192_s1 + $0x18] sm:$0xff]  }
  0x68   : > { %1611 = vrot.lane.b32.xlu0 %v3156_v15, %s3489_s21  ;;  %v2951_v15 = vld [vmem:[%s3540_s19 + $0x3c] sm:$0xc]  ;;  %v917_v22 = vsel %vm3576_vm5, %v915_v11, %v916_v12  ;;  %v3212_v33 = vcombine.low %v977_v28, %v980_v29  ;;  %v3094_v11 = vld [vmem:[%s3540_s19 + $0xb0] sm:$0x3]  ;;  %v3060_v12 = vrot.slane %v3031_v58, 9  ;;  %v3107_v36 = vrot.slane %v3077_v20, 10 }
  0x69   : > { %v2980_v23 = vrot.slane %v2951_v15, 10  ;;  %v4005_v15 = vld [vmem:[%s3540_s19 + $0x94] sm:$0xf]  ;;  %v1376_v28 = vrot.slane %v3094_v11, 6  ;;  %v255_v29 = vld [vmem:[%s3540_s19 + $0x90] sm:$0xe] }
  0x6a   : > { %1721 = vrot.lane.b32.xlu1 %v3179_v8, %s3490_s22  ;;  %v914_v8 = vsel %vm3576_vm5, %v2979_v5, %v913_v50  ;;  %v2999_v50 = vld [vmem:[%s3540_s19 + $0x54] sm:$0xf]  ;;  %v1373_v5 = vrot.slane %v3959_v35, 6  ;;  %v256_v35 = vld [vmem:[%s3540_s19 + $0x98] sm:$0x1]  ;;  %v2845_v46 = vrot.slane %v255_v29, 9 }
  0x6b   : > { %v3203_v30 = vcombine.low %v914_v8, %v917_v22  ;;  %v3220_v6 = vcombine.low %v2999_v50, %v3975_v45  ;;  %v403_v43 = vrot.slane %v256_v35, 5  ;;  %v242_v29 = vld [vmem:[%s3540_s19 + $0x44] sm:$0x1] }
  0x6c   : > { %1705 = vrot.lane.b32.xlu0 %v3171_v31, %s3490_s22  ;;  %v921_v31 = vsel %vm3576_vm5, %v2980_v23, %v920_v3  ;;  %v3115_v23 = vrot.slane %v3093_v10, 10  ;;  %v257_v10 = vld [vmem:[%s3540_s19 + $0x9c] sm:$0xe] }
  0x6d   : > { %v3204_v38 = vcombine.low %v921_v31, %v924_v32  ;;  %v2507_v31 = vsel %vm2505_vm6, %v3422_v62, 0  ;;  %v3427_v62 = vld [vmem:[%s5192_s1 + $0x8] sm:$0xff]  }
  0x6e   : > { %1723 = vrot.lane.b32.xlu1 %v3180_v40, %s3490_s22  ;;  %v3968_v40 = vld [vmem:[%s3540_s19 + $0xb8] sm:$0xf]  ;;  %3312 = vmatpush3.bf16.msra.mxu0 %v2507_v31 }
  0x6f   : > { %v1204_v49 = vrot.slane %v3968_v40, 5  ;;  %v3228_v63 = vcombine.low %v3015_v25, %v3968_v40  ;;  %3358 = vmatpush3.bf16.msra.mxu1 %v2507_v31  ;;  %3313 = vmatprep.subr.bf16.mxu0 %v3423_v1  ;;  %v1380_v44 = vrot.slane %v3968_v40, 6  ;;  %v1324_v40 = vrot.slane %v3975_v45, 6 }
  0x70   : > { %1707 = vrot.lane.b32.xlu0 %v3172_v51, %s3490_s22  ;;  %v3030_v51 = vld [vmem:[%s3540_s19 + $0x50] sm:$0x1]  ;;  %3354 = vmatprep.subr.bf16.mxu1 %v3423_v1 }
  0x71   : > { %v1144_v61 = vrot.slane %v3030_v51, 5  ;;  %v1206_v3 = vrot.slane %v1204_v49, 4  ;;  %v1205_v8 = vsel %vm3542_vm2, %v3068_v2, %v1204_v49  ;;  %v1374_v49 = vsel %vm3576_vm5, %v3115_v23, %v1373_v5 }
  0x72   : > { %1801 = vrot.lane.b32.xlu1 %v3195_v59, %s3491_s23  ;;  %v3032_v59 = vld [vmem:[%s3540_s19 + $0x5c] sm:$0x1]  ;;  %3314 = vmatpush3.bf16.msra.mxu0 %v3423_v1  ;;  %v1326_v20 = vrot.slane %v1324_v40, 4 }
  0x73   : > { %v1151_v14 = vrot.slane %v3032_v59, 5  ;;  %v1145_v19 = vsel %vm3542_vm2, %v1143_v48, %v1144_v61  ;;  %v1318_v59 = vsel %vm3576_vm5, %v3107_v36, %v1317_v16  ;;  %v3079_v61 = vld [vmem:[%s3540_s19 + $0x54] sm:$0xc]  ;;  %3359 = vmatpush3.bf16.msra.mxu1 %v3423_v1  ;;  %3315 = vmatprep.subr.bf16.mxu0 %v3424_v18 }
  0x74   : > { %1785 = vrot.lane.b32.xlu0 %v3187_v4, %s3491_s23  ;;  %v1207_v4 = vrot.slane %v3048_v55, 5  ;;  %v3235_v32 = vcombine.low %v1142_v17, %v1145_v19  ;;  %v2837_v55 = vrot.slane %v239_v41, 9  ;;  %3355 = vmatprep.subr.bf16.mxu1 %v3424_v18  ;;  %v3108_v16 = vrot.slane %v3079_v61, 10  ;;  %v258_v17 = vld [vmem:[%s3540_s19 + $0xa4] sm:$0x1] }
  0x76   : > { %1803 = vrot.lane.b32.xlu1 %v3196_v13, %s3491_s23  ;;  %v1150_v13 = vrot.slane %v1148_v57, 4  ;;  %v1208_v22 = vsel %vm3542_vm2, %v1206_v3, %v1207_v4  ;;  %v3116_v3 = vrot.slane %v3095_v52, 10  ;;  %v3080_v4 = vld [vmem:[%s3540_s19 + $0x5c] sm:$0x3]  ;;  %3316 = vmatpush3.bf16.msra.mxu0 %v3424_v18  ;;  %v1325_v36 = vsel %vm3576_vm5, %v3108_v16, %v1324_v40 }
  0x77   : > { %v3244_v25 = vcombine.low %v1205_v8, %v1208_v22  ;;  %v1327_v1 = vrot.slane %v3080_v4, 6  ;;  %3360 = vmatpush3.bf16.msra.mxu1 %v3424_v18  ;;  %3317 = vmatprep.subr.bf16.mxu0 %v3427_v62  ;;  %v3432_v22 = vld [vmem:[%s5192_s1] sm:$0xff]   ;;  %v436_v4 = vld [vmem:[%s3540_s19 + $0x3c] sm:$0xc] }
  0x78   : > { %1787 = vrot.lane.b32.xlu0 %v3188_v21, %s3491_s23  ;;  %v3243_v21 = vcombine.low %v1198_v7, %v1201_v9  ;;  %v1152_v34 = vsel %vm3542_vm2, %v1150_v13, %v1151_v14  ;;  %v1382_v7 = vrot.slane %v1380_v44, 4  ;;  %v345_v14 = vsel %vm3542_vm2, %v2837_v55, %v344_v42  ;;  %3356 = vmatprep.subr.bf16.mxu1 %v3427_v62 }
  0x79   : > { %v1328_v41 = vsel %vm3576_vm5, %v1326_v20, %v1327_v1 }
  0x7a   : > { %1881 = vrot.lane.b32.xlu1 %v3211_v27, %s3492_s24  ;;  %v1375_v27 = vrot.slane %v1373_v5, 4  ;;  %v4072_v5 = vld [vmem:[%s3540_s19 + $0x40] sm:$0xf]  ;;  %3318 = vmatpush3.bf16.msra.mxu0 %v3427_v62  ;;  %v3252_v55 = vcombine.low %v1325_v36, %v1328_v41 }
  0x7b   : > { %v351_v8 = vrot.slane %v4072_v5, 5  ;;  %3361 = vmatpush3.bf16.msra.mxu1 %v3427_v62  ;;  %3319 = vmatprep.subr.bf16.mxu0 %v3432_v22 }
  0x7c   : > { %1865 = vrot.lane.b32.xlu0 %v3203_v30, %s3492_s24  ;;  %v400_v30 = vrot.slane %v4005_v15, 5  ;;  %v1377_v50 = vsel %vm3576_vm5, %v1375_v27, %v1376_v28  ;;  %v1381_v27 = vsel %vm3576_vm5, %v3116_v3, %v1380_v44  ;;  %v2846_v28 = vrot.slane %v257_v10, 9  ;;  %3357 = vmatprep.subr.bf16.mxu1 %v3432_v22 }
  0x7d   : > { %v353_v42 = vrot.slane %v351_v8, 4  ;;  %v354_v44 = vrot.slane %v242_v29, 5 }
  0x7e   : > { %1883 = vrot.lane.b32.xlu1 %v3212_v33, %s3492_s24  ;;  %v1149_v33 = vsel %vm3542_vm2, %v3060_v12, %v1148_v57  ;;  %v402_v51 = vrot.slane %v400_v30, 4  ;;  %v4055_v57 = vld [vmem:[%s3540_s19 + $0xa0] sm:$0xf]  ;;  %v401_v2 = vsel %vm3542_vm2, %v2845_v46, %v400_v30  ;;  %3320 = vmatpush3.bf16.msra.mxu0 %v3432_v22 }
  0x7f   : > { %v3236_v54 = vcombine.low %v1149_v33, %v1152_v34  ;;  %v407_v11 = vrot.slane %v4055_v57, 5  ;;  %v450_v33 = vld [vmem:[%s3540_s19 + $0x90] sm:$0xc]  ;;  %v579_v34 = vrot.slane %v4005_v15, 6  ;;  %v523_v15 = vrot.slane %v4025_v26, 6  ;;  %3362 = vmatpush3.bf16.msra.mxu1 %v3432_v22 }
  0x80   : > { %1867 = vrot.lane.b32.xlu0 %v3204_v38, %s3492_s24  ;;  %v1320_v38 = vrot.slane %v3078_v24, 6  ;;  %v586_v40 = vrot.slane %v4055_v57, 6  ;;  %v530_v57 = vrot.slane %v4072_v5, 6 }
  0x81   : > { %v409_v31 = vrot.slane %v407_v11, 4  ;;  %v581_v52 = vrot.slane %v579_v34, 4  ;;  %v525_v61 = vrot.slane %v523_v15, 4 }
  0x82   : > { %1977 = vrot.lane.b32.xlu1 %v3227_v47, %s3493_s25  ;;  %v240_v47 = vld [vmem:[%s3540_s19 + $0x38] sm:$0x1]  ;;  %v1321_v45 = vsel %vm3576_vm5, %v1319_v37, %v1320_v38  ;;  %v588_v10 = vrot.slane %v586_v40, 4 }
  0x83   : > { %v347_v48 = vrot.slane %v240_v47, 5  ;;  %v3251_v13 = vcombine.low %v1318_v59, %v1321_v45  ;;  %v451_v38 = vld [vmem:[%s3540_s19 + $0x98] sm:$0x3]  ;;  %v452_v45 = vld [vmem:[%s3540_s19 + $0x9c] sm:$0xc] }
  0x84   : > { %1961 = vrot.lane.b32.xlu0 %v3219_v56, %s3493_s25  ;;  %v3096_v56 = vld [vmem:[%s3540_s19 + $0xbc] sm:$0x3]  ;;  %v582_v26 = vrot.slane %v451_v38, 6  ;;  %v2922_v38 = vld [vmem:[%s3540_s19 + $0xb0] sm:$0x1] }
  0x85   : > { %v1383_v9 = vrot.slane %v3096_v56, 6  ;;  %v348_v19 = vsel %vm3542_vm2, %v346_v60, %v347_v48  ;;  %v453_v60 = vld [vmem:[%s3540_s19 + $0xa4] sm:$0x3]  ;;  %v355_v48 = vsel %vm3542_vm2, %v353_v42, %v354_v44  ;;  %v2905_v44 = vld [vmem:[%s3540_s19 + $0x48] sm:$0xe] }
  0x86   : > { %1979 = vrot.lane.b32.xlu1 %v3228_v63, %s3493_s25  ;;  %v3259_v63 = vcombine.low %v1374_v49, %v1377_v50  ;;  %v3141_v18 = vcombine.low %v345_v14, %v348_v19  ;;  %v408_v49 = vsel %vm3542_vm2, %v2846_v28, %v407_v11  ;;  %v2861_v50 = vrot.slane %v450_v33, 10  ;;  %v2889_v33 = vld [vmem:[%s3540_s19 + $0xa8] sm:$0xf] }
  0x87   : > { %v1384_v30 = vsel %vm3576_vm5, %v1382_v7, %v1383_v9  ;;  %v583_v7 = vsel %vm3576_vm5, %v581_v52, %v582_v26  ;;  %v2862_v9 = vrot.slane %v452_v45, 10  ;;  %v589_v11 = vrot.slane %v453_v60, 6  ;;  %v2923_v45 = vld [vmem:[%s3540_s19 + $0xb4] sm:$0xe] }
  0x88   : > { %1963 = vrot.lane.b32.xlu0 %v3220_v6, %s3493_s25  ;;  %v404_v6 = vsel %vm3542_vm2, %v402_v51, %v403_v43  ;;  %v3260_v47 = vcombine.low %v1381_v27, %v1384_v30  ;;  %v435_v51 = vld [vmem:[%s3540_s19 + $0x38] sm:$0x3]  ;;  %v580_v3 = vsel %vm3576_vm5, %v2861_v50, %v579_v34  ;;  %v532_v19 = vrot.slane %v530_v57, 4  ;;  %v4161_v30 = vld [vmem:[%s3540_s19 + $0xac] sm:$0xf] }
  0x89   : > { %v3149_v24 = vcombine.low %v401_v2, %v404_v6  ;;  %v526_v62 = vrot.slane %v435_v51, 6  ;;  %v437_v6 = vld [vmem:[%s3540_s19 + $0x44] sm:$0x3]  ;;  %v590_v22 = vsel %vm3576_vm5, %v588_v10, %v589_v11  ;;  %v807_v34 = vrot.slane %v4161_v30, 5  ;;  %v4186_v51 = vld [vmem:[%s3540_s19 + $0xb8] sm:$0xf] }
  0x8a   : > { %2057 = vrot.lane.b32.xlu1 %v3243_v21, %s3494_s26  ;;  %v241_v21 = vld [vmem:[%s3540_s19 + $0x3c] sm:$0xe]  ;;  %v533_v20 = vrot.slane %v437_v6, 6  ;;  %v3181_v50 = vcombine.low %v2889_v33, %v4161_v30  ;;  %v810_v26 = vrot.slane %v2922_v38, 5  ;;  %v2942_v11 = vrot.slane %v2923_v45, 9 }
  0x8b   : > { %v2838_v37 = vrot.slane %v241_v21, 9  ;;  %v527_v16 = vsel %vm3576_vm5, %v525_v61, %v526_v62  ;;  %v3165_v21 = vcombine.low %v580_v3, %v583_v7  ;;  %v809_v52 = vrot.slane %v807_v34, 4  ;;  %v4195_v61 = vld [vmem:[%s3540_s19 + $0x58] sm:$0xf]  ;;  %v2924_v62 = vld [vmem:[%s3540_s19 + $0xbc] sm:$0x1] }
  0x8c   : > { %2041 = vrot.lane.b32.xlu0 %v3235_v32, %s3494_s26  ;;  %v4051_v53 = vpop.permute.xlu1 %1527  ;;  %v410_v32 = vrot.slane %v258_v17, 5  ;;  %v2854_v17 = vrot.slane %v436_v4, 10  ;;  %v534_v29 = vsel %vm3576_vm5, %v532_v19, %v533_v20  ;;  %v758_v3 = vrot.slane %v4195_v61, 5  ;;  %v2907_v4 = vld [vmem:[%s3540_s19 + $0x54] sm:$0xe] }
  0x8d   : > { %v4057_v58 = vpop.permute.xlu0 %1525  ;;  %v352_v56 = vsel %vm3542_vm2, %v2838_v37, %v351_v8  ;;  %v587_v8 = vsel %vm3576_vm5, %v2862_v9, %v586_v40  ;;  %v2921_v37 = vld [vmem:[%s3540_s19 + $0xa8] sm:$0xe]  ;;  %v814_v40 = vrot.slane %v4186_v51, 5  ;;  %v811_v10 = vsel %vm3542_vm2, %v809_v52, %v810_v26  ;;  %v2956_v52 = vld [vmem:[%s3540_s19 + $0x5c] sm:$0x3] }
  0x8e   : > { %2059 = vrot.lane.b32.xlu1 %v3244_v25, %s3494_s26  ;;  %v434_v25 = vld [vmem:[%s3540_s19 + $0x30] sm:$0xc]  ;;  %v411_v43 = vsel %vm3542_vm2, %v409_v31, %v410_v32  ;;  %v531_v28 = vsel %vm3576_vm5, %v2854_v17, %v530_v57  ;;  %v3166_v32 = vcombine.low %v587_v8, %v590_v22  ;;  %v983_v57 = vrot.slane %v4161_v30, 6  ;;  %v2969_v20 = vld [vmem:[%s3540_s19 + $0xa8] sm:$0xc] }
  0x8f   : > { %v2853_v59 = vrot.slane %v434_v25, 10  ;;  %v3150_v2 = vcombine.low %v408_v49, %v411_v43  ;;  %v3158_v42 = vcombine.low %v531_v28, %v534_v29  ;;  %v2906_v25 = vld [vmem:[%s3540_s19 + $0x50] sm:$0x1]  ;;  %v2941_v43 = vrot.slane %v2921_v37, 9  ;;  %v2953_v29 = vld [vmem:[%s3540_s19 + $0x48] sm:$0xc] }
  0x90   : > { %2043 = vrot.lane.b32.xlu0 %v3236_v54, %s3494_s26  ;;  %v4079_v12 = vpop.permute.xlu1 %1543  ;;  %v816_v17 = vrot.slane %v814_v40, 4  ;;  %v817_v19 = vrot.slane %v2924_v62, 5  ;;  %v2934_v28 = vrot.slane %v2907_v4, 9  ;;  %v2954_v30 = vld [vmem:[%s3540_s19 + $0x50] sm:$0x3]  ;;  %v760_v33 = vrot.slane %v758_v3, 4 }
  0x91   : > { %v524_v14 = vsel %vm3576_vm5, %v2853_v59, %v523_v15  ;;  %v2873_v15 = vld [vmem:[%s3540_s19 + $0x48] sm:$0xf]  ;;  %v754_v59 = vrot.slane %v2906_v25, 5  ;;  %v808_v9 = vsel %vm3542_vm2, %v2941_v43, %v807_v34  ;;  %v2972_v25 = vld [vmem:[%s3540_s19 + $0xbc] sm:$0x3] }
  0x92   : > { %v4091_v23 = vpop.permute.xlu0 %1541  ;;  %2137 = vrot.lane.b32.xlu1 %v3259_v63, %s3495_s27  ;;  %v3157_v27 = vcombine.low %v524_v14, %v527_v16  ;;  %v3197_v38 = vcombine.low %v808_v9, %v811_v10  ;;  %v201_v45 = vld [vmem:[%s3540_s19 + $0xc] sm:$0xf]  ;;  %v4246_v4 = vld [vmem:[%s3540_s19] sm:$0xf] }
  0x94   : > { %2121 = vrot.lane.b32.xlu0 %v3251_v13, %s3495_s27  ;;  %v4102_v35 = vpop.permute.xlu1 %1621  ;;  %v3142_v13 = vcombine.low %v352_v56, %v355_v48 }
  0x96   : > { %v4111_v46 = vpop.permute.xlu0 %1605  ;;  %1549 = vrot.lane.b32.xlu1 %v3149_v24, %s3488_s20 }
  0x98   : > { %1533 = vrot.lane.b32.xlu0 %v3141_v18, %s3488_s20  ;;  %v4121_v54 = vpop.permute.xlu1 %1623  ;;  %v4169_v18 = vld [vmem:[%s3540_s19 + $0x4c] sm:$0xf] }
  0x99   : > { %v751_v36 = vrot.slane %v4169_v18, 5  ;;  %v3173_v48 = vcombine.low %v2873_v15, %v4169_v18  ;;  %v927_v8 = vrot.slane %v4169_v18, 6  ;;  %v934_v18 = vrot.slane %v4195_v61, 6  ;;  %v2955_v15 = vld [vmem:[%s3540_s19 + $0x54] sm:$0xc] }
  0x9a   : > { %v4130_v63 = vpop.permute.xlu0 %1607  ;;  %2139 = vrot.lane.b32.xlu1 %v3260_v47, %s3495_s27  ;;  %v2891_v47 = vld [vmem:[%s3540_s19 + $0xb4] sm:$0xf]  ;;  %v2982_v9 = vrot.slane %v2955_v15, 10 }
  0x9b   : > { %v753_v56 = vrot.slane %v751_v36, 4  ;;  %v3182_v7 = vcombine.low %v2891_v47, %v4186_v51  ;;  %v818_v47 = vsel %vm3542_vm2, %v816_v17, %v817_v19  ;;  %v936_v10 = vrot.slane %v934_v18, 4  ;;  %v4259_v17 = vld [vmem:[%s3540_s19 + $0x60] sm:$0xf] }
  0x9c   : > { %2123 = vrot.lane.b32.xlu0 %v3252_v55, %s3495_s27  ;;  %v4140_v5 = vpop.permute.xlu1 %1717  ;;  %v2933_v55 = vrot.slane %v2905_v44, 9  ;;  %v815_v44 = vsel %vm3542_vm2, %v2942_v11, %v814_v40  ;;  %v929_v40 = vrot.slane %v927_v8, 4  ;;  %v937_v11 = vrot.slane %v2956_v52, 6  ;;  %v3454_v52 = vld [vmem:[%s3540_s19 + $0x64] sm:$0xf] }
  0x9d   : > { %v755_v16 = vsel %vm3542_vm2, %v753_v56, %v754_v59  ;;  %v2981_v56 = vrot.slane %v2953_v29, 10  ;;  %v930_v59 = vrot.slane %v2954_v30, 6  ;;  %v3452_v29 = vld [vmem:[%s3540_s19 + $0x4] sm:$0xf]  ;;  %v4298_v15 = vsel %vm3576_vm5, %v2982_v9, %v934_v18 }
  0x9e   : > { %v4146_v1 = vpop.permute.xlu0 %1701  ;;  %1551 = vrot.lane.b32.xlu1 %v3150_v2, %s3488_s20  ;;  %v2875_v2 = vld [vmem:[%s3540_s19 + $0x54] sm:$0xf]  ;;  %v752_v14 = vsel %vm3542_vm2, %v2933_v55, %v751_v36  ;;  %v759_v55 = vsel %vm3542_vm2, %v2934_v28, %v758_v3  ;;  %v3198_v3 = vcombine.low %v815_v44, %v818_v47  ;;  %v3121_v30 = vcombine.low %v4246_v4, %v3452_v29  ;;  %v3049_v4 = vld [vmem:[%s3540_s19 + $0xc0] sm:$0xe] }
  0x9f   : > { %v2971_v36 = vld [vmem:[%s3540_s19 + $0xb4] sm:$0xc]  ;;  %v4302_v47 = vsel %vm3576_vm5, %v936_v10, %v937_v11  ;;  %v3052_v29 = vld [vmem:[%s3540_s19 + $0xd4] sm:$0x1] }
  0xa0   : > { %1535 = vrot.lane.b32.xlu0 %v3142_v13, %s3488_s20  ;;  %v4154_v24 = vpop.permute.xlu1 %1719  ;;  %v2908_v13 = vld [vmem:[%s3540_s19 + $0x5c] sm:$0x1]  ;;  %v3206_v10 = vcombine.low %v4298_v15, %v4302_v47 }
  0xa1   : > { %v761_v34 = vrot.slane %v2908_v13, 5  ;;  %v4252_v13 = vld [vmem:[%s3540_s19 + $0x6c] sm:$0xf] }
  0xa2   : > { %v4163_v31 = vpop.permute.xlu0 %1703  ;;  %1629 = vrot.lane.b32.xlu1 %v3165_v21, %s3489_s21  ;;  %v2970_v21 = vld [vmem:[%s3540_s19 + $0xb0] sm:$0x3] }
  0xa3   : > { %v986_v43 = vrot.slane %v2970_v21, 6  ;;  %v928_v21 = vsel %vm3576_vm5, %v2981_v56, %v927_v8 }
  0xa4   : > { %1613 = vrot.lane.b32.xlu0 %v3157_v27, %s3489_s21  ;;  %v4175_v41 = vpop.permute.xlu1 %1797  ;;  %v3174_v27 = vcombine.low %v2875_v2, %v4195_v61  ;;  %v2990_v61 = vrot.slane %v2971_v36, 10  ;;  %v993_v2 = vrot.slane %v2972_v25, 6  ;;  %v4283_v36 = vld [vmem:[%s3540_s19 + $0xc4] sm:$0xf] }
  0xa5   : > { %v1211_v18 = vrot.slane %v4283_v36, 5 }
  0xa6   : > { %v4181_v49 = vpop.permute.xlu0 %1781  ;;  %1631 = vrot.lane.b32.xlu1 %v3166_v32, %s3489_s21  ;;  %v990_v32 = vrot.slane %v4186_v51, 6  ;;  %v985_v51 = vrot.slane %v983_v57, 4 }
  0xa8   : > { %1615 = vrot.lane.b32.xlu0 %v3158_v42, %s3489_s21  ;;  %v4191_v60 = vpop.permute.xlu1 %1799  ;;  %v3189_v42 = vcombine.low %v752_v14, %v755_v16  ;;  %v992_v62 = vrot.slane %v990_v32, 4  ;;  %v987_v16 = vsel %vm3576_vm5, %v985_v51, %v986_v43  ;;  %v4308_v51 = vld [vmem:[%s3540_s19 + $0xcc] sm:$0xf]  ;;  %v4311_v43 = vld [vmem:[%s3540_s19 + $0xd0] sm:$0xf] }
  0xaa   : > { %v4202_v6 = vpop.permute.xlu0 %1783  ;;  %1725 = vrot.lane.b32.xlu1 %v3181_v50, %s3490_s22  ;;  %v2989_v50 = vrot.slane %v2969_v20, 10  ;;  %v4277_v8 = vsel %vm3576_vm5, %v992_v62, %v993_v2 }
  0xac   : > { %1709 = vrot.lane.b32.xlu0 %v3173_v48, %s3490_s22  ;;  %v4219_v22 = vpop.permute.xlu1 %1877  ;;  %v762_v48 = vsel %vm3542_vm2, %v760_v33, %v761_v34  ;;  %v984_v14 = vsel %vm3576_vm5, %v2989_v50, %v983_v57  ;;  %v931_v57 = vsel %vm3576_vm5, %v929_v40, %v930_v59  ;;  %v4273_v33 = vsel %vm3576_vm5, %v2990_v61, %v990_v32  ;;  %v4280_v34 = vld [vmem:[%s3540_s19 + $0xc0] sm:$0xf]  ;;  %v4305_v50 = vld [vmem:[%s3540_s19 + $0x64] sm:$0xf]  ;;  %v4317_v40 = vld [vmem:[%s3540_s19 + $0x6c] sm:$0xf] }
  0xad   : > { %v3190_v20 = vcombine.low %v759_v55, %v762_v48  ;;  %v3213_v25 = vcombine.low %v984_v14, %v987_v16  ;;  %v3129_v55 = vcombine.low %v4259_v17, %v3454_v52  ;;  %v3205_v56 = vcombine.low %v928_v21, %v931_v57  ;;  %v4320_v59 = vld [vmem:[%s3540_s19 + $0x70] sm:$0xf]  ;;  %v3033_v16 = vld [vmem:[%s3540_s19 + $0x60] sm:$0xe]  ;;  %v3034_v17 = vld [vmem:[%s3540_s19 + $0x68] sm:$0x1] }
  0xae   : > { %v4226_v37 = vpop.permute.xlu0 %1861  ;;  %1727 = vrot.lane.b32.xlu1 %v3182_v7, %s3490_s22  ;;  %v3214_v48 = vcombine.low %v4273_v33, %v4277_v8  ;;  %v3229_v62 = vcombine.low %v4280_v34, %v4283_v36  ;;  %v1155_v2 = vrot.slane %v4305_v50, 5  ;;  %v1162_v33 = vrot.slane %v4320_v59, 5  ;;  %v3036_v14 = vld [vmem:[%s3540_s19 + $0x74] sm:$0x1] }
  0xaf   : > { %v3069_v8 = vrot.slane %v3049_v4, 9  ;;  %v1213_v34 = vrot.slane %v1211_v18, 4  ;;  %v3222_v47 = vcombine.low %v4317_v40, %v4320_v59  ;;  %v3061_v52 = vrot.slane %v3033_v16, 9 }
  0xb0   : > { %1711 = vrot.lane.b32.xlu0 %v3174_v27, %s3490_s22  ;;  %v4238_v26 = vpop.permute.xlu1 %1879  ;;  %v3451_v27 = vld [vmem:[%s3540_s19 + $0x10] sm:$0xf]  ;;  %v1157_v57 = vrot.slane %v1155_v2, 4  ;;  %v1158_v11 = vrot.slane %v3034_v17, 5  ;;  %v2176_v4 = vsel %vm2149_vm7, %v3129_v55, %v4091_v23  ;;  %v1221_v61 = vrot.slane %v3052_v29, 5 }
  0xb1   : > { %v3122_v28 = vcombine.low %v201_v45, %v3451_v27  ;;  %v2216_v17 = vsel %vm2198_vm8, %v2176_v4, %v4102_v35  ;;  %v4374_v23 = vsel %vm3542_vm2, %v3069_v8, %v1211_v18  ;;  %v1164_v35 = vrot.slane %v1162_v33, 4 }
  0xb2   : > { %v4248_v7 = vpop.permute.xlu0 %1863  ;;  %1805 = vrot.lane.b32.xlu1 %v3197_v38, %s3491_s23  ;;  %v4286_v38 = vld [vmem:[%s3540_s19 + $0x60] sm:$0xf]  ;;  %v5204_v4 = vcombine.low %v4308_v51, %v4311_v43 }
  0xb3   : > { %v4335_v9 = vsel %vm2149_vm7, %v3122_v28, %v4051_v53  ;;  %v1218_v53 = vrot.slane %v4311_v43, 5  ;;  %v3051_v28 = vld [vmem:[%s3540_s19 + $0xcc] sm:$0xe] }
  0xb4   : > { %1789 = vrot.lane.b32.xlu0 %v3189_v42, %s3491_s23  ;;  %v4262_v19 = vpop.permute.xlu1 %1973  ;;  %v4289_v42 = vld [vmem:[%s3540_s19 + $0x70] sm:$0xf]  ;;  %v3070_v27 = vrot.slane %v3051_v28, 9 }
  0xb5   : > { %v3130_v44 = vcombine.low %v4252_v13, %v4289_v42  ;;  %v1165_v42 = vrot.slane %v3036_v14, 5 }
  0xb6   : > { %v4293_v32 = vpop.permute.xlu0 %1957  ;;  %1807 = vrot.lane.b32.xlu1 %v3198_v3, %s3491_s23  ;;  %v3050_v3 = vld [vmem:[%s3540_s19 + $0xc8] sm:$0x1] }
  0xb7   : > { %v1214_v15 = vrot.slane %v3050_v3, 5  ;;  %v2179_v16 = vsel %vm2149_vm7, %v3130_v44, %v4079_v12  ;;  %v4387_v12 = vsel %vm3542_vm2, %v3061_v52, %v1155_v2  ;;  %v3097_v44 = vld [vmem:[%s3540_s19 + $0xc0] sm:$0xc]  ;;  %v3098_v2 = vld [vmem:[%s3540_s19 + $0xc8] sm:$0x3] }
  0xb8   : > { %1791 = vrot.lane.b32.xlu0 %v3190_v20, %s3491_s23  ;;  %v4323_v45 = vpop.permute.xlu1 %1975  ;;  %v2152_v20 = vsel %vm2149_vm7, %v3121_v30, %v4057_v58  ;;  %v3035_v58 = vld [vmem:[%s3540_s19 + $0x6c] sm:$0xe] }
  0xb9   : > { %v4378_v55 = vsel %vm3542_vm2, %v1213_v34, %v1214_v15  ;;  %v2200_v18 = vsel %vm2198_vm8, %v2152_v20, %v4111_v46  ;;  %v1390_v34 = vrot.slane %v3098_v2, 6 }
  0xba   : > { %v4346_v21 = vpop.permute.xlu0 %1959  ;;  %1885 = vrot.lane.b32.xlu1 %v3213_v25, %s3492_s24  ;;  %v3062_v25 = vrot.slane %v3035_v58, 9  ;;  %v2233_v14 = vsel %vm2231_vm9, %v2200_v18, %v4146_v1  ;;  %v3245_v58 = vcombine.low %v4374_v23, %v4378_v55  ;;  %v4458_v55 = vld [vmem:[%s3540_s19 + $0x4c] sm:$0xf] }
  0xbb   : > { %v2266_v20 = vsel %vm2264_vm10, %v2233_v14, %v4181_v49  ;;  %v5203_v49 = vcombine.low %v4286_v38, %v4305_v50  ;;  %5205 = vst [vmem:[#allocation2_spill] sm:$0xff] %v4458_v55  ;;  %v358_v2 = vrot.slane %v4458_v55, 5 }
  0xbc   : > { %1869 = vrot.lane.b32.xlu0 %v3205_v56, %s3492_s24  ;;  %v2054_v30 = vpop.permute.xlu1 %2053  ;;  %v1220_v56 = vrot.slane %v1218_v53, 4 }
  0xbe   : > { %v2038_v3 = vpop.permute.xlu0 %2037  ;;  %1887 = vrot.lane.b32.xlu1 %v3214_v48, %s3492_s24  ;;  %v2249_v48 = vsel %vm2231_vm9, %v2216_v17, %v4140_v5  ;;  %v4396_v5 = vsel %vm3542_vm2, %v1157_v57, %v1158_v11  ;;  %v4416_v11 = vsel %vm3542_vm2, %v3062_v25, %v1162_v33  ;;  %v259_v17 = vld [vmem:[%s3540_s19 + $0xa8] sm:$0xe] }
  0xbf   : > { %v2282_v28 = vsel %vm2264_vm10, %v2249_v48, %v4175_v41  ;;  %v4412_v41 = vsel %vm3542_vm2, %v1220_v56, %v1221_v61  ;;  %v2299_v61 = vsel %vm2297_vm11, %v2266_v20, %v4226_v37  ;;  %v3237_v38 = vcombine.low %v4387_v12, %v4396_v5 }
  0xc0   : > { %1871 = vrot.lane.b32.xlu0 %v3206_v10, %s3492_s24  ;;  %v4383_v13 = vpop.permute.xlu1 %2055  ;;  %v4400_v10 = vsel %vm3542_vm2, %v3070_v27, %v1218_v53  ;;  %v2315_v29 = vsel %vm2297_vm11, %v2282_v28, %v4219_v22  ;;  %v3117_v22 = vrot.slane %v3097_v44, 10  ;;  %v5202_v53 = vrot.slane %v4283_v36, 6  ;;  %v4426_v27 = vld [vmem:[%s3540_s19 + $0xac] sm:$0xf] }
  0xc1   : > { %v2348_v1 = vsel %vm2330_vm12, %v2315_v29, %v4262_v19  ;;  %v4437_v19 = vsel %vm3542_vm2, %v1164_v35, %v1165_v42  ;;  %v2332_v15 = vsel %vm2330_vm12, %v2299_v61, %v4293_v32  ;;  %v3246_v32 = vcombine.low %v4400_v10, %v4412_v41  ;;  %v260_v42 = vld [vmem:[%s3540_s19 + $0xb0] sm:$0x1]  ;;  %v243_v10 = vld [vmem:[%s3540_s19 + $0x48] sm:$0xe] }
  0xc2   : > { %v4407_v46 = vpop.permute.xlu0 %2039  ;;  %1981 = vrot.lane.b32.xlu1 %v3229_v62, %s3493_s25  ;;  %v1389_v57 = vrot.slane %v5202_v53, 4  ;;  %v3081_v62 = vld [vmem:[%s3540_s19 + $0x60] sm:$0xc]  ;;  %v2381_v33 = vsel %vm2363_vm13, %v2348_v1, %v2054_v30  ;;  %v3082_v30 = vld [vmem:[%s3540_s19 + $0x68] sm:$0x3]  ;;  %v2365_v25 = vsel %vm2363_vm13, %v2332_v15, %v2038_v3  ;;  %v414_v23 = vrot.slane %v4426_v27, 5 }
  0xc3   : > { %v3109_v56 = vrot.slane %v3081_v62, 10  ;;  %v2218_v3 = vsel %vm2198_vm8, %v2179_v16, %v4121_v54  ;;  %v3238_v51 = vcombine.low %v4416_v11, %v4437_v19  ;;  %v5206_v12 = vrot.slane %v4305_v50, 6  ;;  %v244_v41 = vld [vmem:[%s3540_s19 + $0x50] sm:$0x1]  ;;  %v3099_v1 = vld [vmem:[%s3540_s19 + $0xcc] sm:$0xc] }
  0xc4   : > { %1965 = vrot.lane.b32.xlu0 %v5203_v49, %s3493_s25  ;;  %v2134_v8 = vpop.permute.xlu1 %2133  ;;  %v2251_v44 = vsel %vm2231_vm9, %v2218_v3, %v4154_v24  ;;  %v5207_v16 = vmov %v5202_v53  ;;  %v1391_v28 = vsel %vm3576_vm5, %v1389_v57, %v1390_v34  ;;  %v1334_v5 = vrot.slane %v3082_v30, 6  ;;  %v3100_v50 = vld [vmem:[%s3540_s19 + $0xd4] sm:$0x3]  ;;  %v4516_v62 = vld [vmem:[%s3540_s19 + $0xb8] sm:$0xf] }
  0xc5   : > { %v2414_v37 = vsel %vm2396_vm14, %v2381_v33, %v2134_v8  ;;  %v1333_v35 = vrot.slane %v5206_v12, 4  ;;  %v1388_v18 = vsel %vm3576_vm5, %v3117_v22, %v5207_v16  ;;  %v2202_v24 = vsel %vm2198_vm8, %v4335_v9, %v4130_v63  ;;  %5209 = vst [vmem:[#allocation3_spill] sm:$0xff] %v4516_v62  ;;  %v3083_v49 = vld [vmem:[%s3540_s19 + $0x6c] sm:$0xc]  ;;  %v262_v3 = vld [vmem:[%s3540_s19 + $0xbc] sm:$0x1] }
  0xc6   : > { %v2118_v52 = vpop.permute.xlu0 %2117  ;;  %1983 = vrot.lane.b32.xlu1 %v5204_v4, %s3493_s25  ;;  %3337 = vmatprep.mubr.msk.bf16.mxu1 %vm2472_vm15, %v2414_v37  ;;  %v2284_v40 = vsel %vm2264_vm10, %v2251_v44, %v4191_v60  ;;  %v2235_v36 = vsel %vm2231_vm9, %v2202_v24, %v4163_v31  ;;  %v416_v63 = vrot.slane %v414_v23, 4  ;;  %v417_v9 = vrot.slane %v260_v42, 5  ;;  %v3084_v37 = vld [vmem:[%s3540_s19 + $0x74] sm:$0x3] }
  0xc7   : > { %v2398_v48 = vsel %vm2396_vm14, %v2365_v25, %v2118_v52  ;;  %v2317_v14 = vsel %vm2297_vm11, %v2284_v40, %v4238_v26  ;;  %v2268_v60 = vsel %vm2264_vm10, %v2235_v36, %v4202_v6  ;;  %v3261_v31 = vcombine.low %v1388_v18, %v1391_v28  ;;  %v261_v52 = vld [vmem:[%s3540_s19 + $0xb4] sm:$0xe]  ;;  %v246_v40 = vld [vmem:[%s3540_s19 + $0x5c] sm:$0x1]  ;;  %v454_v36 = vld [vmem:[%s3540_s19 + $0xa8] sm:$0xc] }
  0xc8   : > { %1967 = vrot.lane.b32.xlu0 %v3222_v47, %s3493_s25  ;;  %3321 = vmatprep.mubr.msk.bf16.mxu0 %vm2472_vm15, %v2398_v48  ;;  %v4475_v54 = vpop.permute.xlu1 %1545  ;;  %v2847_v47 = vrot.slane %v259_v17, 9  ;;  %v2350_v11 = vsel %vm2330_vm12, %v2317_v14, %v4323_v45  ;;  %v5208_v20 = vmov %v5206_v12  ;;  %v2301_v22 = vsel %vm2297_vm11, %v2268_v60, %v4248_v7 }
  0xc9   : > { %v1332_v26 = vsel %vm3576_vm5, %v3109_v56, %v5208_v20  ;;  %v2383_v53 = vsel %vm2363_vm13, %v2350_v11, %v4383_v13  ;;  %v1335_v45 = vsel %vm3576_vm5, %v1333_v35, %v1334_v5  ;;  %v2839_v57 = vrot.slane %v243_v10, 9  ;;  %v455_v11 = vld [vmem:[%s3540_s19 + $0xb0] sm:$0x3] }
  0xca   : > { %v4494_v29 = vpop.permute.xlu0 %1529  ;;  %2061 = vrot.lane.b32.xlu1 %v3245_v58, %s3494_s26  ;;  %v2334_v61 = vsel %vm2330_vm12, %v2301_v22, %v4346_v21  ;;  %v360_v33 = vrot.slane %v358_v2, 4  ;;  %v361_v13 = vrot.slane %v244_v41, 5  ;;  %v415_v34 = vsel %vm3542_vm2, %v2847_v47, %v414_v23  ;;  %v4532_v58 = vld [vmem:[%s3540_s19 + $0x58] sm:$0xf] }
  0xcb   : > { %v2367_v8 = vsel %vm2363_vm13, %v2334_v61, %v4407_v46  ;;  %v418_v21 = vsel %vm3542_vm2, %v416_v63, %v417_v9  ;;  %v3118_v15 = vrot.slane %v3099_v1, 10  ;;  %5210 = vst [vmem:[#allocation4_spill] sm:$0xff] %v4532_v58  ;;  %v5211_v46 = vrot.slane %v4311_v43, 6  ;;  %v438_v1 = vld [vmem:[%s3540_s19 + $0x48] sm:$0xc] }
  0xcc   : > { %2045 = vrot.lane.b32.xlu0 %v3237_v38, %s3494_s26  ;;  %v2136_v6 = vpop.permute.xlu1 %2135  ;;  %v1397_v25 = vrot.slane %v3100_v50, 6  ;;  %v421_v4 = vrot.slane %v4516_v62, 5  ;;  %v3253_v56 = vcombine.low %v1332_v26, %v1335_v45  ;;  %v359_v17 = vsel %vm3542_vm2, %v2839_v57, %v358_v2  ;;  %v439_v45 = vld [vmem:[%s3540_s19 + $0x50] sm:$0x3] }
  0xcd   : > { %v2416_v7 = vsel %vm2396_vm14, %v2383_v53, %v2136_v6  ;;  %v1396_v30 = vrot.slane %v5211_v46, 4  ;;  %v3110_v23 = vrot.slane %v3083_v49, 10  ;;  %v362_v48 = vsel %vm3542_vm2, %v360_v33, %v361_v13 }
  0xce   : > { %v2120_v19 = vpop.permute.xlu0 %2119  ;;  %2063 = vrot.lane.b32.xlu1 %v3246_v32, %s3494_s26  ;;  %3338 = vmatmul.mubr.msk.bf16.vlgmr.msra.gmra.mxu1 %vm2472_vm15, %v2416_v7  ;;  %v5212_v12 = vrot.slane %v4320_v59, 6  ;;  %v1341_v42 = vrot.slane %v3084_v37, 6  ;;  %v365_v44 = vrot.slane %v4532_v58, 5  ;;  %v3151_v18 = vcombine.low %v415_v34, %v418_v21  ;;  %v457_v34 = vld [vmem:[%s3540_s19 + $0xbc] sm:$0x3] }
  0xcf   : > { %v2400_v38 = vsel %vm2396_vm14, %v2367_v8, %v2120_v19  ;;  %v5213_v28 = vmov %v5211_v46  ;;  %v2848_v24 = vrot.slane %v261_v52, 9  ;;  %v1398_v47 = vsel %vm3576_vm5, %v1396_v30, %v1397_v25  ;;  %v456_v19 = vld [vmem:[%s3540_s19 + $0xb4] sm:$0xc] }
  0xd0   : > { %2047 = vrot.lane.b32.xlu0 %v3238_v51, %s3494_s26  ;;  %3322 = vmatmul.mubr.msk.bf16.vlgmr.msra.gmra.mxu0 %vm2472_vm15, %v2400_v38  ;;  %v4541_v32 = vpop.permute.xlu1 %1547  ;;  %v1340_v35 = vrot.slane %v5212_v12, 4  ;;  %v245_v51 = vld [vmem:[%s3540_s19 + $0x54] sm:$0xe]  ;;  %v1395_v5 = vsel %vm3576_vm5, %v3118_v15, %v5213_v28  ;;  %v423_v10 = vrot.slane %v421_v4, 4  ;;  %v424_v2 = vrot.slane %v262_v3, 5 }
  0xd1   : > { %v593_v14 = vrot.slane %v4426_v27, 6  ;;  %v3143_v43 = vcombine.low %v359_v17, %v362_v48  ;;  %v5214_v9 = vmov %v5212_v12  ;;  %v2840_v60 = vrot.slane %v245_v51, 9  ;;  %v440_v52 = vld [vmem:[%s3540_s19 + $0x54] sm:$0xc] }
  0xd2   : > { %v4552_v16 = vpop.permute.xlu0 %1531  ;;  %2141 = vrot.lane.b32.xlu1 %v3261_v31, %s3495_s27  ;;  %v1339_v41 = vsel %vm3576_vm5, %v3110_v23, %v5214_v9  ;;  %v1342_v31 = vsel %vm3576_vm5, %v1340_v35, %v1341_v42  ;;  %v367_v20 = vrot.slane %v365_v44, 4  ;;  %v368_v26 = vrot.slane %v246_v40, 5  ;;  %v4629_v9 = vld [vmem:[%s3540_s19 + $0xc4] sm:$0xf] }
  0xd3   : > { %v537_v27 = vrot.slane %v4458_v55, 6  ;;  %v3262_v59 = vcombine.low %v1395_v5, %v1398_v47  ;;  %v422_v53 = vsel %vm3542_vm2, %v2848_v24, %v421_v4  ;;  %v2863_v6 = vrot.slane %v454_v36, 10  ;;  %v441_v4 = vld [vmem:[%s3540_s19 + $0x5c] sm:$0x3]  ;;  %v3040_v55 = vld [vmem:[%s3540_s19 + $0x8c] sm:$0x1] }
  0xd4   : > { %2125 = vrot.lane.b32.xlu0 %v3253_v56, %s3495_s27  ;;  %v4565_v63 = vpop.permute.xlu1 %1625  ;;  %v425_v57 = vsel %vm3542_vm2, %v423_v10, %v424_v2  ;;  %v595_v50 = vrot.slane %v593_v14, 4  ;;  %v596_v61 = vrot.slane %v455_v11, 6  ;;  %v600_v7 = vrot.slane %v4516_v62, 6 }
  0xd5   : > { %v3254_v13 = vcombine.low %v1339_v41, %v1342_v31  ;;  %v366_v49 = vsel %vm3542_vm2, %v2840_v60, %v365_v44  ;;  %v2855_v8 = vrot.slane %v438_v1, 10  ;;  %v369_v21 = vsel %vm3542_vm2, %v367_v20, %v368_v26  ;;  %v2893_v41 = vld [vmem:[%s3540_s19 + $0xc0] sm:$0xf]  ;;  %v4637_v20 = vld [vmem:[%s3540_s19 + $0x64] sm:$0xf] }
  0xd6   : > { %v4576_v22 = vpop.permute.xlu0 %1609  ;;  %1553 = vrot.lane.b32.xlu1 %v3151_v18, %s3488_s20  ;;  %v539_v15 = vrot.slane %v537_v27, 4  ;;  %v540_v37 = vrot.slane %v439_v45, 6  ;;  %v544_v38 = vrot.slane %v4532_v58, 6  ;;  %v3152_v30 = vcombine.low %v422_v53, %v425_v57  ;;  %v2925_v26 = vld [vmem:[%s3540_s19 + $0xc0] sm:$0xe] }
  0xd7   : > { %v594_v25 = vsel %vm3576_vm5, %v2863_v6, %v593_v14  ;;  %v597_v56 = vsel %vm3576_vm5, %v595_v50, %v596_v61  ;;  %v2864_v17 = vrot.slane %v456_v19, 10  ;;  %v602_v23 = vrot.slane %v600_v7, 4  ;;  %v2926_v1 = vld [vmem:[%s3540_s19 + $0xc8] sm:$0x1]  ;;  %v2895_v53 = vld [vmem:[%s3540_s19 + $0xcc] sm:$0xf] }
  0xd8   : > { %1537 = vrot.lane.b32.xlu0 %v3143_v43, %s3488_s20  ;;  %v4586_v33 = vpop.permute.xlu1 %1627  ;;  %v603_v3 = vrot.slane %v457_v34, 6  ;;  %v3144_v12 = vcombine.low %v366_v49, %v369_v21  ;;  %v538_v35 = vsel %vm3576_vm5, %v2855_v8, %v537_v27  ;;  %v541_v42 = vsel %vm3576_vm5, %v539_v15, %v540_v37  ;;  %v2877_v27 = vld [vmem:[%s3540_s19 + $0x60] sm:$0xf]  ;;  %v4649_v57 = vld [vmem:[%s3540_s19 + $0xd0] sm:$0xf] }
  0xd9   : > { %v2856_v51 = vrot.slane %v440_v52, 10  ;;  %v546_v44 = vrot.slane %v544_v38, 4  ;;  %v547_v18 = vrot.slane %v441_v4, 6  ;;  %v3167_v5 = vcombine.low %v594_v25, %v597_v56  ;;  %v2909_v50 = vld [vmem:[%s3540_s19 + $0x60] sm:$0xe] }
  0xda   : > { %v4595_v46 = vpop.permute.xlu0 %1611  ;;  %2143 = vrot.lane.b32.xlu1 %v3262_v59, %s3495_s27  ;;  %v601_v24 = vsel %vm3576_vm5, %v2864_v17, %v600_v7  ;;  %v604_v40 = vsel %vm3576_vm5, %v602_v23, %v603_v3  ;;  %v3159_v10 = vcombine.low %v538_v35, %v541_v42  ;;  %v821_v60 = vrot.slane %v4629_v9, 5  ;;  %v2910_v61 = vld [vmem:[%s3540_s19 + $0x68] sm:$0x1]  ;;  %v2927_v19 = vld [vmem:[%s3540_s19 + $0xcc] sm:$0xe] }
  0xdb   : > { %v545_v2 = vsel %vm3576_vm5, %v2856_v51, %v544_v38  ;;  %v548_v36 = vsel %vm3576_vm5, %v546_v44, %v547_v18  ;;  %v3168_v43 = vcombine.low %v601_v24, %v604_v40  ;;  %v765_v59 = vrot.slane %v4637_v20, 5  ;;  %v2879_v15 = vld [vmem:[%s3540_s19 + $0x6c] sm:$0xf]  ;;  %v4661_v37 = vld [vmem:[%s3540_s19 + $0x70] sm:$0xf] }
  0xdc   : > { %2127 = vrot.lane.b32.xlu0 %v3254_v13, %s3495_s27  ;;  %v4605_v48 = vpop.permute.xlu1 %1721  ;;  %v3160_v31 = vcombine.low %v545_v2, %v548_v36  ;;  %v3183_v45 = vcombine.low %v2893_v41, %v4629_v9  ;;  %v828_v7 = vrot.slane %v4649_v57, 5  ;;  %v2943_v13 = vrot.slane %v2925_v26, 9  ;;  %v2928_v38 = vld [vmem:[%s3540_s19 + $0xd4] sm:$0x1]  ;;  %v2911_v56 = vld [vmem:[%s3540_s19 + $0x6c] sm:$0xe] }
  0xdd   : > { %v823_v49 = vrot.slane %v821_v60, 4  ;;  %v824_v8 = vrot.slane %v2926_v1, 5  ;;  %v3175_v21 = vcombine.low %v2877_v27, %v4637_v20  ;;  %v2935_v25 = vrot.slane %v2909_v50, 9  ;;  %v2912_v35 = vld [vmem:[%s3540_s19 + $0x74] sm:$0x1] }
  0xde   : > { %v4611_v28 = vpop.permute.xlu0 %1705  ;;  %1555 = vrot.lane.b32.xlu1 %v3152_v30, %s3488_s20  ;;  %v772_v30 = vrot.slane %v4661_v37, 5  ;;  %v767_v52 = vrot.slane %v765_v59, 4  ;;  %v768_v4 = vrot.slane %v2910_v61, 5  ;;  %v997_v23 = vrot.slane %v4629_v9, 6  ;;  %v2973_v2 = vld [vmem:[%s3540_s19 + $0xc0] sm:$0xc] }
  0xdf   : > { %v3184_v3 = vcombine.low %v2895_v53, %v4649_v57  ;;  %v822_v42 = vsel %vm3542_vm2, %v2943_v13, %v821_v60  ;;  %v825_v51 = vsel %vm3542_vm2, %v823_v49, %v824_v8  ;;  %v830_v44 = vrot.slane %v828_v7, 4  ;;  %v2974_v36 = vld [vmem:[%s3540_s19 + $0xc8] sm:$0x3]  ;;  %v2976_v49 = vld [vmem:[%s3540_s19 + $0xd4] sm:$0x3] }
  0xe0   : > { %1539 = vrot.lane.b32.xlu0 %v3144_v12, %s3488_s20  ;;  %v4619_v47 = vpop.permute.xlu1 %1723  ;;  %v2944_v12 = vrot.slane %v2927_v19, 9  ;;  %v831_v18 = vrot.slane %v2928_v38, 5  ;;  %v3176_v40 = vcombine.low %v2879_v15, %v4661_v37  ;;  %v769_v9 = vsel %vm3542_vm2, %v767_v52, %v768_v4  ;;  %v2958_v53 = vld [vmem:[%s3540_s19 + $0x68] sm:$0x3]  ;;  %v2960_v4 = vld [vmem:[%s3540_s19 + $0x74] sm:$0x3]  ;;  %s5085_s20 = scalar_lea.vmem %s5194_s3, %s3289_s17 }
  0xe1   : > { %v774_v41 = vrot.slane %v772_v30, 4  ;;  %v775_v60 = vrot.slane %v2912_v35, 5  ;;  %v1004_v26 = vrot.slane %v4649_v57, 6  ;;  %v3199_v1 = vcombine.low %v822_v42, %v825_v51  ;;  %v4713_v35 = vld [vmem:[%s3540_s19 + $0x78] sm:$0xf] }
  0xe2   : > { %v4625_v14 = vpop.permute.xlu0 %1707  ;;  %1633 = vrot.lane.b32.xlu1 %v3167_v5, %s3489_s21  ;;  %v941_v5 = vrot.slane %v4637_v20, 6  ;;  %v829_v27 = vsel %vm3542_vm2, %v2944_v12, %v828_v7  ;;  %v2991_v50 = vrot.slane %v2973_v2, 10  ;;  %v999_v61 = vrot.slane %v997_v23, 4 }
  0xe3   : > { %v1000_v13 = vrot.slane %v2974_v36, 6  ;;  %v948_v8 = vrot.slane %v4661_v37, 6  ;;  %v776_v15 = vsel %vm3542_vm2, %v774_v41, %v775_v60  ;;  %v944_v52 = vrot.slane %v2958_v53, 6  ;;  %v4736_v60 = vld [vmem:[%s3540_s19 + $0xdc] sm:$0xf] }
  0xe4   : > { %1617 = vrot.lane.b32.xlu0 %v3159_v10, %s3489_s21  ;;  %v4634_v11 = vpop.permute.xlu1 %1801  ;;  %v2936_v10 = vrot.slane %v2911_v56, 9  ;;  %v1006_v12 = vrot.slane %v1004_v26, 4  ;;  %v998_v42 = vsel %vm3576_vm5, %v2991_v50, %v997_v23  ;;  %v951_v36 = vrot.slane %v2960_v4, 6  ;;  %v4729_v23 = vld [vmem:[%s3540_s19 + $0x24] sm:$0xf] }
  0xe5   : > { %v1001_v51 = vsel %vm3576_vm5, %v999_v61, %v1000_v13  ;;  %v950_v2 = vrot.slane %v948_v8, 4  ;;  %v3455_v50 = vld [vmem:[%s3540_s19 + $0x7c] sm:$0xf] }
  0xe6   : > { %v4644_v6 = vpop.permute.xlu0 %1785  ;;  %1635 = vrot.lane.b32.xlu1 %v3168_v43, %s3489_s21  ;;  %v766_v43 = vsel %vm3542_vm2, %v2935_v25, %v765_v59  ;;  %v2975_v59 = vld [vmem:[%s3540_s19 + $0xcc] sm:$0xc]  ;;  %v773_v7 = vsel %vm3542_vm2, %v2936_v10, %v772_v30  ;;  %v943_v25 = vrot.slane %v941_v5, 4  ;;  %v1007_v30 = vrot.slane %v2976_v49, 6  ;;  %v3456_v13 = vld [vmem:[%s3540_s19 + $0x1c] sm:$0xf] }
  0xe7   : > { %v3191_v19 = vcombine.low %v766_v43, %v769_v9  ;;  %v4726_v43 = vld [vmem:[%s3540_s19 + $0x84] sm:$0xf]  ;;  %v3131_v61 = vcombine.low %v4713_v35, %v3455_v50  ;;  %v952_v4 = vsel %vm3576_vm5, %v950_v2, %v951_v36 }
  0xe8   : > { %1619 = vrot.lane.b32.xlu0 %v3160_v31, %s3489_s21  ;;  %v4656_v34 = vpop.permute.xlu1 %1803  ;;  %v2957_v31 = vld [vmem:[%s3540_s19 + $0x60] sm:$0xc]  ;;  %v945_v41 = vsel %vm3576_vm5, %v943_v25, %v944_v52  ;;  %v1008_v53 = vsel %vm3576_vm5, %v1006_v12, %v1007_v30  ;;  %v4780_v12 = vld [vmem:[%s3540_s19 + $0x84] sm:$0xf]  ;;  %v4783_v30 = vld [vmem:[%s3540_s19 + $0x28] sm:$0xf] }
  0xe9   : > { %v2983_v38 = vrot.slane %v2957_v31, 10 }
  0xea   : > { %v4666_v17 = vpop.permute.xlu0 %1787  ;;  %1729 = vrot.lane.b32.xlu1 %v3183_v45, %s3490_s22  ;;  %v832_v45 = vsel %vm3542_vm2, %v830_v44, %v831_v18  ;;  %v4720_v44 = vld [vmem:[%s3540_s19 + $0x18] sm:$0xf] }
  0xeb   : > { %v3200_v37 = vcombine.low %v829_v27, %v832_v45  ;;  %v942_v9 = vsel %vm3576_vm5, %v2983_v38, %v941_v5  ;;  %v4746_v5 = vld [vmem:[%s3540_s19 + $0xd8] sm:$0xf]  ;;  %v3123_v49 = vcombine.low %v4720_v44, %v3456_v13  ;;  %v4790_v44 = vld [vmem:[%s3540_s19 + $0x88] sm:$0xf] }
  0xec   : > { %1713 = vrot.lane.b32.xlu0 %v3175_v21, %s3490_s22  ;;  %v4678_v24 = vpop.permute.xlu1 %1881  ;;  %v2959_v21 = vld [vmem:[%s3540_s19 + $0x6c] sm:$0xc]  ;;  %v4750_v45 = vld [vmem:[%s3540_s19 + $0x78] sm:$0xf]  ;;  %v3207_v25 = vcombine.low %v942_v9, %v945_v41  ;;  %v3231_v2 = vcombine.low %v4746_v5, %v4736_v60 }
  0xed   : > { %v2984_v10 = vrot.slane %v2959_v21, 10  ;;  %v4762_v21 = vld [vmem:[%s3540_s19 + $0x88] sm:$0xf] }
  0xee   : > { %v4688_v20 = vpop.permute.xlu0 %1865  ;;  %1731 = vrot.lane.b32.xlu1 %v3184_v3, %s3490_s22  ;;  %v2992_v3 = vrot.slane %v2975_v59, 10  ;;  %v1225_v59 = vrot.slane %v4736_v60, 5 }
  0xef   : > { %v949_v52 = vsel %vm3576_vm5, %v2984_v10, %v948_v8 }
  0xf0   : > { %1715 = vrot.lane.b32.xlu0 %v3176_v40, %s3490_s22  ;;  %v4701_v57 = vpop.permute.xlu1 %1883  ;;  %v3192_v40 = vcombine.low %v773_v7, %v776_v15  ;;  %v1005_v27 = vsel %vm3576_vm5, %v2992_v3, %v1004_v26  ;;  %v4757_v26 = vld [vmem:[%s3540_s19 + $0x7c] sm:$0xf]  ;;  %v3054_v7 = vld [vmem:[%s3540_s19 + $0xe0] sm:$0x1]  ;;  %v4777_v3 = vld [vmem:[%s3540_s19 + $0xe8] sm:$0xf] }
  0xf1   : > { %v1169_v8 = vrot.slane %v4757_v26, 5  ;;  %v1227_v9 = vrot.slane %v1225_v59, 4  ;;  %v1228_v41 = vrot.slane %v3054_v7, 5  ;;  %v3223_v13 = vcombine.low %v4750_v45, %v4757_v26  ;;  %v3055_v15 = vld [vmem:[%s3540_s19 + $0xe4] sm:$0xe] }
  0xf2   : > { %v4709_v56 = vpop.permute.xlu0 %1867  ;;  %1809 = vrot.lane.b32.xlu1 %v3199_v1, %s3491_s23  ;;  %v3215_v1 = vcombine.low %v998_v42, %v1001_v51  ;;  %v3216_v42 = vcombine.low %v1005_v27, %v1008_v53  ;;  %v3038_v27 = vld [vmem:[%s3540_s19 + $0x80] sm:$0x1]  ;;  %v3208_v53 = vcombine.low %v949_v52, %v952_v4  ;;  %v1232_v35 = vrot.slane %v4777_v3, 5  ;;  %v3056_v51 = vld [vmem:[%s3540_s19 + $0xec] sm:$0x1] }
  0xf3   : > { %5215 = vst [vmem:[#allocation5_spill] sm:$0xff] %v4709_v56  ;;  %v1176_v7 = vrot.slane %v4790_v44, 5  ;;  %v3039_v4 = vld [vmem:[%s3540_s19 + $0x84] sm:$0xe]  ;;  %v1171_v58 = vrot.slane %v1169_v8, 4  ;;  %v1172_v62 = vrot.slane %v3038_v27, 5  ;;  %v4824_v52 = vsel %vm3542_vm2, %v1227_v9, %v1228_v41 }
  0xf4   : > { %1793 = vrot.lane.b32.xlu0 %v3191_v19, %s3491_s23  ;;  %v4723_v18 = vpop.permute.xlu1 %1977  ;;  %v3053_v19 = vld [vmem:[%s3540_s19 + $0xd8] sm:$0xe]  ;;  %v3072_v5 = vrot.slane %v3055_v15, 9  ;;  %v1234_v27 = vrot.slane %v1232_v35, 4  ;;  %v1235_v45 = vrot.slane %v3056_v51, 5  ;;  %v3064_v56 = vrot.slane %v3039_v4, 9 }
  0xf5   : > { %v3071_v36 = vrot.slane %v3053_v19, 9 }
  0xf6   : > { %v4738_v31 = vpop.permute.xlu0 %1961  ;;  %1811 = vrot.lane.b32.xlu1 %v3200_v37, %s3491_s23  ;;  %v4774_v37 = vld [vmem:[%s3540_s19 + $0xe4] sm:$0xf] }
  0xf7   : > { %v3232_v19 = vcombine.low %v4774_v37, %v4777_v3  ;;  %v4820_v37 = vsel %vm3542_vm2, %v3071_v36, %v1225_v59  ;;  %v1179_v36 = vrot.slane %v3040_v55, 5 }
  0xf8   : > { %1795 = vrot.lane.b32.xlu0 %v3192_v40, %s3491_s23  ;;  %v4767_v38 = vpop.permute.xlu1 %1979  ;;  %v3037_v40 = vld [vmem:[%s3540_s19 + $0x78] sm:$0xe] }
  0xf9   : > { %v3063_v50 = vrot.slane %v3037_v40, 9 }
  0xfa   : > { %v4793_v10 = vpop.permute.xlu0 %1963  ;;  %1889 = vrot.lane.b32.xlu1 %v3215_v1, %s3492_s24 }
  0xfb   : > { %5216 = vst [vmem:[#allocation6_spill] sm:$0xff] %v4793_v10 }
  0xfc   : > { %1873 = vrot.lane.b32.xlu0 %v3207_v25, %s3492_s24  ;;  %v2058_v1 = vpop.permute.xlu1 %2057  ;;  %v2182_v25 = vsel %vm2149_vm7, %v3131_v61, %v4475_v54  ;;  %v2158_v54 = vsel %vm2149_vm7, %v3123_v49, %v4494_v29  ;;  %v3247_v29 = vcombine.low %v4820_v37, %v4824_v52  ;;  %v3101_v49 = vld [vmem:[%s3540_s19 + $0xd8] sm:$0xc] }
  0xfd   : > { %v2220_v40 = vsel %vm2198_vm8, %v2182_v25, %v4565_v63  ;;  %v2204_v15 = vsel %vm2198_vm8, %v2158_v54, %v4576_v22  ;;  %v1173_v22 = vsel %vm3542_vm2, %v1171_v58, %v1172_v62  ;;  %v3085_v62 = vld [vmem:[%s3540_s19 + $0x78] sm:$0xc]  ;;  %v5221_v54 = vrot.slane %v4757_v26, 6 }
  0xfe   : > { %v2042_v10 = vpop.permute.xlu0 %2041  ;;  %1891 = vrot.lane.b32.xlu1 %v3216_v42, %s3492_s24  ;;  %v2253_v61 = vsel %vm2231_vm9, %v2220_v40, %v4605_v48  ;;  %v1178_v42 = vrot.slane %v1176_v7, 4  ;;  %v4843_v48 = vsel %vm3542_vm2, %v3063_v50, %v1169_v8  ;;  %v2237_v51 = vsel %vm2231_vm9, %v2204_v15, %v4611_v28  ;;  %v3102_v8 = vld [vmem:[%s3540_s19 + $0xe0] sm:$0x3]  ;;  %v3087_v15 = vld [vmem:[%s3540_s19 + $0x84] sm:$0xc] }
  0xff   : > { %v2286_v63 = vsel %vm2264_vm10, %v2253_v61, %v4634_v11  ;;  %v4857_v11 = vsel %vm3542_vm2, %v3072_v5, %v1232_v35  ;;  %v2270_v41 = vsel %vm2264_vm10, %v2237_v51, %v4644_v6  ;;  %v5217_v5 = vrot.slane %v4736_v60, 6  ;;  %v3088_v51 = vld [vmem:[%s3540_s19 + $0x8c] sm:$0x3] }
 0x100   : > { %1875 = vrot.lane.b32.xlu0 %v3208_v53, %s3492_s24  ;;  %v4833_v59 = vpop.permute.xlu1 %2059  ;;  %v2319_v55 = vsel %vm2297_vm11, %v2286_v63, %v4678_v24  ;;  %v1236_v24 = vsel %vm3542_vm2, %v1234_v27, %v1235_v45  ;;  %v2303_v58 = vsel %vm2297_vm11, %v2270_v41, %v4688_v20  ;;  %v1180_v6 = vsel %vm3542_vm2, %v1178_v42, %v1179_v36  ;;  %v3086_v20 = vld [vmem:[%s3540_s19 + $0x80] sm:$0x3] }
 0x101   : > { %v2352_v28 = vsel %vm2330_vm12, %v2319_v55, %v4723_v18  ;;  %v3119_v18 = vrot.slane %v3101_v49, 10  ;;  %v2336_v50 = vsel %vm2330_vm12, %v2303_v58, %v4738_v31  ;;  %v1404_v52 = vrot.slane %v3102_v8, 6  ;;  %v5225_v8 = vld [vmem:[#allocation5_spill] sm:$0xff] }
 0x102   : > { %v4850_v9 = vpop.permute.xlu0 %2043  ;;  %1985 = vrot.lane.b32.xlu1 %v3231_v2, %s3493_s25  ;;  %v4868_v2 = vsel %vm3542_vm2, %v3064_v56, %v1176_v7  ;;  %v2385_v35 = vsel %vm2363_vm13, %v2352_v28, %v2058_v1  ;;  %v1403_v7 = vrot.slane %v5217_v5, 4  ;;  %v2369_v0 = vsel %vm2363_vm13, %v2336_v50, %v2042_v10 }
 0x103   : > { %v3239_v31 = vcombine.low %v4843_v48, %v1173_v22  ;;  %v3111_v45 = vrot.slane %v3085_v62, 10  ;;  %v5219_v10 = vcombine.low %v4729_v23, %v4783_v30  ;;  %v1347_v61 = vrot.slane %v5221_v54, 4  ;;  %v3104_v23 = vld [vmem:[%s3540_s19 + $0xec] sm:$0x3] }
 0x104   : > { %1969 = vrot.lane.b32.xlu0 %v3223_v13, %s3493_s25  ;;  %v2138_v53 = vpop.permute.xlu1 %2137  ;;  %v5218_v13 = vcombine.low %v4726_v43, %v4762_v21  ;;  %v3248_v43 = vcombine.low %v4857_v11, %v1236_v24  ;;  %v3103_v21 = vld [vmem:[%s3540_s19 + $0xe4] sm:$0xc]  ;;  %v1348_v42 = vrot.slane %v3086_v20, 6  ;;  %v5222_v30 = vmov %v5217_v5 }
 0x105   : > { %v2418_v56 = vsel %vm2396_vm14, %v2385_v35, %v2138_v53  ;;  %v1405_v36 = vsel %vm3576_vm5, %v1403_v7, %v1404_v52  ;;  %v3120_v60 = vrot.slane %v3103_v21, 10  ;;  %v5224_v22 = vrot.slane %v4777_v3, 6  ;;  %v5226_v24 = vld [vmem:[#allocation6_spill] sm:$0xff] }
 0x106   : > { %v2185_v1 = vsel %vm2149_vm7, %v5218_v13, %v4541_v32  ;;  %v2122_v4 = vpop.permute.xlu0 %2121  ;;  %1987 = vrot.lane.b32.xlu1 %v3232_v19, %s3493_s25  ;;  %3341 = vmatprep.mubr.msk.bf16.mxu1 %vm2472_vm15, %v2418_v56  ;;  %v3240_v32 = vcombine.low %v4868_v2, %v1180_v6  ;;  %v2161_v19 = vsel %vm2149_vm7, %v5219_v10, %v4552_v16  ;;  %v1411_v11 = vrot.slane %v3104_v23, 6 }
 0x107   : > { %v2222_v25 = vsel %vm2198_vm8, %v2185_v1, %v4586_v33  ;;  %v2402_v37 = vsel %vm2396_vm14, %v2369_v0, %v2122_v4  ;;  %v5220_v33 = vcombine.low %v4780_v12, %v4790_v44  ;;  %v2206_v16 = vsel %vm2198_vm8, %v2161_v19, %v4595_v46 }
 0x108   : > { %v2255_v40 = vsel %vm2231_vm9, %v2222_v25, %v4619_v47  ;;  %3325 = vmatprep.mubr.msk.bf16.mxu0 %vm2472_vm15, %v2402_v37  ;;  %v4910_v27 = vpop.permute.xlu1 %1549  ;;  %v1402_v12 = vsel %vm3576_vm5, %v3119_v18, %v5222_v30  ;;  %v2239_v63 = vsel %vm2231_vm9, %v2206_v16, %v4625_v14  ;;  %v5223_v46 = vmov %v5221_v54  ;;  %v223_v16 = vld [vmem:[%s3540_s19 + $0x90] sm:$0xf] }
 0x109   : > { %1971 = vrot.lane.b32.xlu0 %v5220_v33, %s3493_s25  ;;  %v2288_v47 = vsel %vm2264_vm10, %v2255_v40, %v4656_v34  ;;  %v1346_v34 = vsel %vm3576_vm5, %v3111_v45, %v5223_v46  ;;  %v2272_v55 = vsel %vm2264_vm10, %v2239_v63, %v4666_v17  ;;  %v1349_v28 = vsel %vm3576_vm5, %v1347_v61, %v1348_v42  ;;  %v207_v30 = vld [vmem:[%s3540_s19 + $0x30] sm:$0xf]  ;;  %v3460_v63 = vld [vmem:[%s3540_s19 + $0x34] sm:$0xf] }
 0x10a   : > { %v2321_v48 = vsel %vm2297_vm11, %v2288_v47, %v4701_v57  ;;  %v4930_v49 = vpop.permute.xlu0 %1533  ;;  %2065 = vrot.lane.b32.xlu1 %v3247_v29, %s3494_s26  ;;  %v1410_v57 = vrot.slane %v5224_v22, 4  ;;  %v2305_v29 = vsel %vm2297_vm11, %v2272_v55, %v5225_v8  ;;  %v3112_v17 = vrot.slane %v3087_v15, 10 }
 0x10b   : > { %v2354_v14 = vsel %vm2330_vm12, %v2321_v48, %v4767_v38  ;;  %v2338_v38 = vsel %vm2330_vm12, %v2305_v29, %v5226_v24  ;;  %v5227_v62 = vrot.slane %v4790_v44, 6  ;;  %v1355_v35 = vrot.slane %v3088_v51, 6  ;;  %v225_v51 = vld [vmem:[%s3540_s19 + $0x9c] sm:$0xf] }
 0x10c   : > { %v2387_v26 = vsel %vm2363_vm13, %v2354_v14, %v4833_v59  ;;  %v2140_v41 = vpop.permute.xlu1 %2139  ;;  %v2371_v53 = vsel %vm2363_vm13, %v2338_v38, %v4850_v9  ;;  %v3263_v6 = vcombine.low %v1402_v12, %v1405_v36  ;;  %v5228_v50 = vmov %v5224_v22  ;;  %v3459_v12 = vld [vmem:[%s3540_s19 + $0x94] sm:$0xf] }
 0x10d   : > { %2049 = vrot.lane.b32.xlu0 %v3239_v31, %s3494_s26  ;;  %v2420_v2 = vsel %vm2396_vm14, %v2387_v26, %v2140_v41  ;;  %v1354_v58 = vrot.slane %v5227_v62, 4  ;;  %v1409_v56 = vsel %vm3576_vm5, %v3120_v60, %v5228_v50  ;;  %v1412_v5 = vsel %vm3576_vm5, %v1410_v57, %v1411_v11  ;;  %v209_v11 = vld [vmem:[%s3540_s19 + $0x3c] sm:$0xf]  ;;  %v3461_v26 = vld [vmem:[%s3540_s19 + $0xa0] sm:$0xf] }
 0x10e   : > { %v2124_v59 = vpop.permute.xlu0 %2123  ;;  %2067 = vrot.lane.b32.xlu1 %v3248_v43, %s3494_s26  ;;  %3342 = vmatmul.mubr.msk.bf16.gmra.mxu1 %vm2472_vm15, %v2420_v2  ;;  %v3255_v7 = vcombine.low %v1346_v34, %v1349_v28  ;;  %v5229_v52 = vmov %v5227_v62  ;;  %v3264_v1 = vcombine.low %v1409_v56, %v1412_v5  ;;  %v3133_v36 = vcombine.low %v223_v16, %v3459_v12 }
 0x10f   : > { %v2404_v18 = vsel %vm2396_vm14, %v2371_v53, %v2124_v59  ;;  %v1353_v20 = vsel %vm3576_vm5, %v3112_v17, %v5229_v52  ;;  %v1356_v3 = vsel %vm3576_vm5, %v1354_v58, %v1355_v35  ;;  %v3125_v48 = vcombine.low %v207_v30, %v3460_v63 }
 0x110   : > { %3326 = vmatmul.mubr.msk.bf16.gmra.mxu0 %vm2472_vm15, %v2404_v18  ;;  %v4969_v9 = vpop.permute.xlu1 %1551  ;;  %v3256_v4 = vcombine.low %v1353_v20, %v1356_v3  ;;  %v2188_v34 = vsel %vm2149_vm7, %v3133_v36, %v4910_v27  ;;  %v3134_v41 = vcombine.low %v225_v51, %v3461_v26  ;;  %v5230_v26 = vld [vmem:[#allocation2_spill] sm:$0xff] }
 0x111   : > { %2051 = vrot.lane.b32.xlu0 %v3240_v32, %s3494_s26  ;;  %v2164_v14 = vsel %vm2149_vm7, %v3125_v48, %v4930_v49  ;;  %v3462_v49 = vld [vmem:[%s3540_s19 + $0x40] sm:$0xf] }
 0x112   : > { %v4977_v13 = vpop.permute.xlu0 %1535  ;;  %2145 = vrot.lane.b32.xlu1 %v3263_v6, %s3495_s27  ;;  %v3126_v2 = vcombine.low %v209_v11, %v3462_v49  ;;  %v2191_v6 = vsel %vm2149_vm7, %v3134_v41, %v4969_v9 }
 0x114   : > { %v1630_v0 = vpop.permute.xlu1 %1629 }
 0x115   : > { %2129 = vrot.lane.b32.xlu0 %v3255_v7, %s3495_s27  ;;  %v2224_v55 = vsel %vm2198_vm8, %v2188_v34, %v1630_v0  ;;  %v2167_v7 = vsel %vm2149_vm7, %v3126_v2, %v4977_v13 }
 0x116   : > { %v1614_v31 = vpop.permute.xlu0 %1613  ;;  %2147 = vrot.lane.b32.xlu1 %v3264_v1, %s3495_s27 }
 0x117   : > { %v2208_v8 = vsel %vm2198_vm8, %v2164_v14, %v1614_v31 }
 0x118   : > { %v1632_v44 = vpop.permute.xlu1 %1631 }
 0x119   : > { %2131 = vrot.lane.b32.xlu0 %v3256_v4, %s3495_s27  ;;  %v2226_v56 = vsel %vm2198_vm8, %v2191_v6, %v1632_v44 }
 0x11a   : > { %v1616_v45 = vpop.permute.xlu0 %1615 }
 0x11b   : > { %v2210_v3 = vsel %vm2198_vm8, %v2167_v7, %v1616_v45 }
 0x11c   : > { %v1726_v25 = vpop.permute.xlu1 %1725 }
 0x11d   : > { %v2257_v22 = vsel %vm2231_vm9, %v2224_v55, %v1726_v25  ;;  %v227_v55 = vld [vmem:[%s3540_s19 + $0xa8] sm:$0xf] }
 0x11e   : > { %v1710_v39 = vpop.permute.xlu0 %1709 }
 0x11f   : > { %v2241_v27 = vsel %vm2231_vm9, %v2208_v8, %v1710_v39 }
 0x120   : > { %v1728_v37 = vpop.permute.xlu1 %1727 }
 0x121   : > { %v2259_v52 = vsel %vm2231_vm9, %v2226_v56, %v1728_v37 }
 0x122   : > { %v1712_v43 = vpop.permute.xlu0 %1711 }
 0x123   : > { %v2243_v1 = vsel %vm2231_vm9, %v2210_v3, %v1712_v43 }
 0x124   : > { %v1806_v32 = vpop.permute.xlu1 %1805 }
 0x125   : > { %v2290_v29 = vsel %vm2264_vm10, %v2257_v22, %v1806_v32  ;;  %v211_v22 = vld [vmem:[%s3540_s19 + $0x48] sm:$0xf] }
 0x126   : > { %v1790_v21 = vpop.permute.xlu0 %1789  ;;  %v3127_v41 = vcombine.low %v211_v22, %v5230_v26 }
 0x127   : > { %v2274_v24 = vsel %vm2264_vm10, %v2241_v27, %v1790_v21 }
 0x128   : > { %v1808_v10 = vpop.permute.xlu1 %1807 }
 0x129   : > { %v2292_v9 = vsel %vm2264_vm10, %v2259_v52, %v1808_v10 }
 0x12a   : > { %v1792_v19 = vpop.permute.xlu0 %1791 }
 0x12b   : > { %v2276_v31 = vsel %vm2264_vm10, %v2243_v1, %v1792_v19 }
 0x12c   : > { %v1886_v40 = vpop.permute.xlu1 %1885 }
 0x12d   : > { %v2323_v28 = vsel %vm2297_vm11, %v2290_v29, %v1886_v40  ;;  %v229_v29 = vld [vmem:[%s3540_s19 + $0xb4] sm:$0xf] }
 0x12e   : > { %v1870_v33 = vpop.permute.xlu0 %1869 }
 0x12f   : > { %v2307_v62 = vsel %vm2297_vm11, %v2274_v24, %v1870_v33  ;;  %v5231_v24 = vld [vmem:[#allocation3_spill] sm:$0xff] }
 0x130   : > { %v1888_v54 = vpop.permute.xlu1 %1887 }
 0x131   : > { %v2325_v0 = vsel %vm2297_vm11, %v2292_v9, %v1888_v54 }
 0x132   : > { %v1872_v61 = vpop.permute.xlu0 %1871 }
 0x133   : > { %v2309_v13 = vsel %vm2297_vm11, %v2276_v31, %v1872_v61 }
 0x134   : > { %v1982_v42 = vpop.permute.xlu1 %1981 }
 0x135   : > { %v2356_v38 = vsel %vm2330_vm12, %v2323_v28, %v1982_v42  ;;  %v213_v28 = vld [vmem:[%s3540_s19 + $0x54] sm:$0xf] }
 0x136   : > { %v1966_v23 = vpop.permute.xlu0 %1965 }
 0x137   : > { %v2340_v53 = vsel %vm2330_vm12, %v2307_v62, %v1966_v23 }
 0x138   : > { %v1984_v47 = vpop.permute.xlu1 %1983 }
 0x139   : > { %v2358_v44 = vsel %vm2330_vm12, %v2325_v0, %v1984_v47 }
 0x13a   : > { %v1968_v15 = vpop.permute.xlu0 %1967 }
 0x13b   : > { %v2342_v37 = vsel %vm2330_vm12, %v2309_v13, %v1968_v15 }
 0x13c   : > { %v2062_v46 = vpop.permute.xlu1 %2061 }
 0x13d   : > { %v2389_v58 = vsel %vm2363_vm13, %v2356_v38, %v2062_v46  ;;  %v3136_v38 = vcombine.low %v229_v29, %v5231_v24 }
 0x13e   : > { %v2046_v60 = vpop.permute.xlu0 %2045 }
 0x13f   : > { %v2373_v18 = vsel %vm2363_vm13, %v2340_v53, %v2046_v60 }
 0x140   : > { %v2064_v57 = vpop.permute.xlu1 %2063 }
 0x141   : > { %v2391_v25 = vsel %vm2363_vm13, %v2358_v44, %v2064_v57  ;;  %v3463_v57 = vld [vmem:[%s3540_s19 + $0xac] sm:$0xf] }
 0x142   : > { %v2048_v17 = vpop.permute.xlu0 %2047  ;;  %v3135_v11 = vcombine.low %v227_v55, %v3463_v57 }
 0x143   : > { %v2375_v32 = vsel %vm2363_vm13, %v2342_v37, %v2048_v17 }
 0x144   : > { %v2142_v35 = vpop.permute.xlu1 %2141 }
 0x145   : > { %v2422_v59 = vsel %vm2396_vm14, %v2389_v58, %v2142_v35  ;;  %v5232_v58 = vld [vmem:[#allocation4_spill] sm:$0xff] }
 0x146   : > { %v2126_v50 = vpop.permute.xlu0 %2125  ;;  %3345 = vmatprep.mubr.msk.bf16.mxu1 %vm2472_vm15, %v2422_v59  ;;  %v3128_v35 = vcombine.low %v213_v28, %v5232_v58 }
 0x147   : > { %v2406_v5 = vsel %vm2396_vm14, %v2373_v18, %v2126_v50 }
 0x148   : > { %3329 = vmatprep.mubr.msk.bf16.mxu0 %vm2472_vm15, %v2406_v5  ;;  %v1554_v20 = vpop.permute.xlu1 %1553 }
 0x149   : > { %v2194_v17 = vsel %vm2149_vm7, %v3135_v11, %v1554_v20 }
 0x14a   : > { %v1538_v4 = vpop.permute.xlu0 %1537 }
 0x14b   : > { %v2170_v62 = vsel %vm2149_vm7, %v3127_v41, %v1538_v4 }
 0x14c   : > { %v2144_v39 = vpop.permute.xlu1 %2143 }
 0x14d   : > { %v2424_v45 = vsel %vm2396_vm14, %v2391_v25, %v2144_v39 }
 0x14e   : > { %v2128_v21 = vpop.permute.xlu0 %2127  ;;  %3346 = vmatmul.mubr.msk.bf16.gmra.mxu1 %vm2472_vm15, %v2424_v45 }
 0x14f   : > { %v2408_v43 = vsel %vm2396_vm14, %v2375_v32, %v2128_v21 }
 0x150   : > { %3330 = vmatmul.mubr.msk.bf16.gmra.mxu0 %vm2472_vm15, %v2408_v43  ;;  %v1556_v10 = vpop.permute.xlu1 %1555 }
 0x151   : > { %v2197_v50 = vsel %vm2149_vm7, %v3136_v38, %v1556_v10 }
 0x152   : > { %v1540_v19 = vpop.permute.xlu0 %1539 }
 0x153   : > { %v2173_v9 = vsel %vm2149_vm7, %v3128_v35, %v1540_v19 }
 0x154   : > { %v1634_v40 = vpop.permute.xlu1 %1633 }
 0x155   : > { %v2228_v2 = vsel %vm2198_vm8, %v2194_v17, %v1634_v40 }
 0x156   : > { %v1618_v33 = vpop.permute.xlu0 %1617 }
 0x157   : > { %v2212_v6 = vsel %vm2198_vm8, %v2170_v62, %v1618_v33 }
 0x158   : > { %v1636_v54 = vpop.permute.xlu1 %1635 }
 0x159   : > { %v2230_v52 = vsel %vm2198_vm8, %v2197_v50, %v1636_v54 }
 0x15a   : > { %v1620_v61 = vpop.permute.xlu0 %1619 }
 0x15b   : > { %v2214_v44 = vsel %vm2198_vm8, %v2173_v9, %v1620_v61 }
 0x15c   : > { %v1730_v42 = vpop.permute.xlu1 %1729 }
 0x15d   : > { %v2261_v53 = vsel %vm2231_vm9, %v2228_v2, %v1730_v42 }
 0x15e   : > { %v1714_v23 = vpop.permute.xlu0 %1713 }
 0x15f   : > { %v2245_v56 = vsel %vm2231_vm9, %v2212_v6, %v1714_v23 }
 0x160   : > { %v1732_v16 = vpop.permute.xlu1 %1731 }
 0x161   : > { %v2263_v1 = vsel %vm2231_vm9, %v2230_v52, %v1732_v16 }
 0x162   : > { %v1716_v47 = vpop.permute.xlu0 %1715 }
 0x163   : > { %v2247_v37 = vsel %vm2231_vm9, %v2214_v44, %v1716_v47 }
 0x164   : > { %v1810_v30 = vpop.permute.xlu1 %1809 }
 0x165   : > { %v2294_v18 = vsel %vm2264_vm10, %v2261_v53, %v1810_v30  ;;  %v5078_v30 = vld [vmem:[%s5193_s2] ss:$0 sm:$0xff] }
 0x166   : > { %v1794_v12 = vpop.permute.xlu0 %1793 }
 0x167   : > { %v2278_v20 = vsel %vm2264_vm10, %v2245_v56, %v1794_v12 }
 0x168   : > { %v1812_v36 = vpop.permute.xlu1 %1811 }
 0x169   : > { %v2296_v13 = vsel %vm2264_vm10, %v2263_v1, %v1812_v36 }
 0x16a   : > { %v1796_v15 = vpop.permute.xlu0 %1795 }
 0x16b   : > { %v2280_v43 = vsel %vm2264_vm10, %v2247_v37, %v1796_v15 }
 0x16c   : > { %v1890_v63 = vpop.permute.xlu1 %1889 }
 0x16d   : > { %v2327_v5 = vsel %vm2297_vm11, %v2294_v18, %v1890_v63 }
 0x16e   : > { %v1874_v48 = vpop.permute.xlu0 %1873 }
 0x16f   : > { %v2311_v0 = vsel %vm2297_vm11, %v2278_v20, %v1874_v48 }
 0x170   : > { %v1892_v46 = vpop.permute.xlu1 %1891 }
 0x171   : > { %v2329_v45 = vsel %vm2297_vm11, %v2296_v13, %v1892_v46 }
 0x172   : > { %v1876_v34 = vpop.permute.xlu0 %1875 }
 0x173   : > { %v2313_v40 = vsel %vm2297_vm11, %v2280_v43, %v1876_v34 }
 0x174   : > { %v1986_v60 = vpop.permute.xlu1 %1985 }
 0x175   : > { %v2360_v3 = vsel %vm2330_vm12, %v2327_v5, %v1986_v60 }
 0x176   : > { %v1970_v51 = vpop.permute.xlu0 %1969 }
 0x177   : > { %v2344_v25 = vsel %vm2330_vm12, %v2311_v0, %v1970_v51 }
 0x178   : > { %v1988_v14 = vpop.permute.xlu1 %1987 }
 0x179   : > { %v2362_v10 = vsel %vm2330_vm12, %v2329_v45, %v1988_v14 }
 0x17b   : > { %v1972_v8 = vpop.permute.xlu0 %1971 }
 0x17c   : > { %v2066_v27 = vpop.permute.xlu1 %2065  ;;  %v2346_v61 = vsel %vm2330_vm12, %v2313_v40, %v1972_v8 }
 0x17d   : > { %v2393_v4 = vsel %vm2363_vm13, %v2360_v3, %v2066_v27 }
 0x17f   : > { %v2050_v49 = vpop.permute.xlu0 %2049 }
 0x180   : > { %v2068_v59 = vpop.permute.xlu1 %2067  ;;  %v2377_v32 = vsel %vm2363_vm13, %v2344_v25, %v2050_v49 }
 0x181   : > { %v2395_v33 = vsel %vm2363_vm13, %v2362_v10, %v2068_v59 }
 0x183   : > { %v2052_v7 = vpop.permute.xlu0 %2051 }
 0x184   : > { %v2146_v31 = vpop.permute.xlu1 %2145  ;;  %v2379_v23 = vsel %vm2363_vm13, %v2346_v61, %v2052_v7 }
 0x185   : > { %v2426_v39 = vsel %vm2396_vm14, %v2393_v4, %v2146_v31 }
 0x186   : > { %3349 = vmatprep.mubr.msk.bf16.mxu1 %vm2472_vm15, %v2426_v39 }
 0x187   : > { %v2130_v21 = vpop.permute.xlu0 %2129 }
 0x188   : > { %v2410_v19 = vsel %vm2396_vm14, %v2377_v32, %v2130_v21  ;;  %v2148_v54 = vpop.permute.xlu1 %2147 }
 0x189   : > { %3333 = vmatprep.mubr.msk.bf16.mxu0 %vm2472_vm15, %v2410_v19  ;;  %v2428_v42 = vsel %vm2396_vm14, %v2395_v33, %v2148_v54 }
 0x18a   : > { %3350 = vmatmul.mubr.msk.bf16.gmra.mxu1 %vm2472_vm15, %v2428_v42 }
 0x18b   : > { %v2132_v16 = vpop.permute.xlu0 %2131 }
 0x18c   : > { %v2412_v47 = vsel %vm2396_vm14, %v2379_v23, %v2132_v16 }
 0x18d   : > { %3334 = vmatmul.mubr.msk.bf16.gmra.mxu0 %vm2472_vm15, %v2412_v47 }
 0x18e   : > { %v3339_v12 = vpop.f32.mrf.mxu1 }
 0x18f   : > { %v2616_v36 = vadd.f32 %v3339_v12, %v5078_v30 }
 0x190   : > { %v3323_v15 = vpop.f32.mrf.mxu0  ;;  %v2607_v63 = vpop.f32.mrf.mxu1 }
 0x191   : > { %v2552_v48 = vadd.f32 %v3323_v15, %v5078_v30  ;;  %v2688_v46 = vmax.f32 %v2616_v36, 0.0  ;;  %v2608_v34 = vadd.f32 %v5078_v30, %v2607_v63 }
 0x192   : > { %v2543_v60 = vpop.f32.mrf.mxu0  ;;  %v3340_v51 = vpop.f32.mrf.mxu1 }
 0x193   : > { %v2672_v55 = vmax.f32 %v2552_v48, 0.0  ;;  %2720 = vst.msk [vmem:[%s5085_s20 + $0x90] sm:$0xff] %vm2264_vm10, %v2688_v46  ;;  %v2544_v14 = vadd.f32 %v5078_v30, %v2543_v60  ;;  %v2686_v22 = vmax.f32 %v2608_v34, 0.0  ;;  %v2619_v57 = vadd.f32 %v3340_v51, %v5078_v30 }
 0x194   : > { %v3324_v11 = vpop.f32.mrf.mxu0  ;;  %v2610_v8 = vpop.f32.mrf.mxu1 }
 0x195   : > { %2704 = vst.msk [vmem:[%s5085_s20 + $0x10] sm:$0xff] %vm2264_vm10, %v2672_v55  ;;  %v2670_v29 = vmax.f32 %v2544_v14, 0.0  ;;  %2718 = vst.msk [vmem:[%s5085_s20 + $0x80] sm:$0xff] %vm2264_vm10, %v2686_v22  ;;  %v2555_v26 = vadd.f32 %v3324_v11, %v5078_v30  ;;  %v2689_v41 = vmax.f32 %v2619_v57, 0.0  ;;  %v2611_v27 = vadd.f32 %v5078_v30, %v2610_v8 }
 0x196   : > { %v2546_v28 = vpop.f32.mrf.mxu0 }
 0x197   : > { %2702 = vst.msk [vmem:[%s5085_s20] sm:$0xff] %vm2264_vm10, %v2670_v29  ;;  %v2673_v17 = vmax.f32 %v2555_v26, 0.0  ;;  %2721 = vst.msk [vmem:[%s5085_s20 + $0x98] sm:$0xff] %vm2264_vm10, %v2689_v41  ;;  %v2547_v24 = vadd.f32 %v5078_v30, %v2546_v28  ;;  %v2687_v38 = vmax.f32 %v2611_v27, 0.0 }
 0x199   : > { %2705 = vst.msk [vmem:[%s5085_s20 + $0x18] sm:$0xff] %vm2264_vm10, %v2673_v17  ;;  %v2671_v49 = vmax.f32 %v2547_v24, 0.0  ;;  %2719 = vst.msk [vmem:[%s5085_s20 + $0x88] sm:$0xff] %vm2264_vm10, %v2687_v38 }
 0x19b   : > { %2703 = vst.msk [vmem:[%s5085_s20 + $0x8] sm:$0xff] %vm2264_vm10, %v2671_v49 }
 0x1ce   : > { %v3343_v2 = vpop.f32.mrf.mxu1 }
 0x1cf   : > { %v2632_v62 = vadd.f32 %v3343_v2, %v5078_v30 }
 0x1d0   : > { %v3327_v58 = vpop.f32.mrf.mxu0  ;;  %v2623_v35 = vpop.f32.mrf.mxu1 }
 0x1d1   : > { %v2568_v53 = vadd.f32 %v3327_v58, %v5078_v30  ;;  %v2692_v59 = vmax.f32 %v2632_v62, 0.0  ;;  %v2624_v6 = vadd.f32 %v5078_v30, %v2623_v35 }
 0x1d2   : > { %v2559_v18 = vpop.f32.mrf.mxu0  ;;  %v3344_v50 = vpop.f32.mrf.mxu1 }
 0x1d3   : > { %v2676_v56 = vmax.f32 %v2568_v53, 0.0  ;;  %2724 = vst.msk [vmem:[%s5085_s20 + $0xb0] sm:$0xff] %vm2264_vm10, %v2692_v59  ;;  %v2560_v5 = vadd.f32 %v5078_v30, %v2559_v18  ;;  %v2690_v7 = vmax.f32 %v2624_v6, 0.0  ;;  %v2635_v52 = vadd.f32 %v3344_v50, %v5078_v30 }
 0x1d4   : > { %v3328_v20 = vpop.f32.mrf.mxu0  ;;  %v2626_v3 = vpop.f32.mrf.mxu1 }
 0x1d5   : > { %2708 = vst.msk [vmem:[%s5085_s20 + $0x30] sm:$0xff] %vm2264_vm10, %v2676_v56  ;;  %v2674_v9 = vmax.f32 %v2560_v5, 0.0  ;;  %2722 = vst.msk [vmem:[%s5085_s20 + $0xa0] sm:$0xff] %vm2264_vm10, %v2690_v7  ;;  %v2571_v1 = vadd.f32 %v3328_v20, %v5078_v30  ;;  %v2693_v0 = vmax.f32 %v2635_v52, 0.0  ;;  %v2627_v4 = vadd.f32 %v5078_v30, %v2626_v3 }
 0x1d6   : > { %v2562_v31 = vpop.f32.mrf.mxu0 }
 0x1d7   : > { %2706 = vst.msk [vmem:[%s5085_s20 + $0x20] sm:$0xff] %vm2264_vm10, %v2674_v9  ;;  %v2677_v44 = vmax.f32 %v2571_v1, 0.0  ;;  %2725 = vst.msk [vmem:[%s5085_s20 + $0xb8] sm:$0xff] %vm2264_vm10, %v2693_v0  ;;  %v2563_v13 = vadd.f32 %v5078_v30, %v2562_v31  ;;  %v2691_v25 = vmax.f32 %v2627_v4, 0.0 }
 0x1d9   : > { %2709 = vst.msk [vmem:[%s5085_s20 + $0x38] sm:$0xff] %vm2264_vm10, %v2677_v44  ;;  %v2675_v39 = vmax.f32 %v2563_v13, 0.0  ;;  %2723 = vst.msk [vmem:[%s5085_s20 + $0xa8] sm:$0xff] %vm2264_vm10, %v2691_v25 }
 0x1db   : > { %2707 = vst.msk [vmem:[%s5085_s20 + $0x28] sm:$0xff] %vm2264_vm10, %v2675_v39 }
 0x20e   : > { %v3347_v37 = vpop.f32.mrf.mxu1 }
 0x20f   : > { %v2648_v45 = vadd.f32 %v3347_v37, %v5078_v30 }
 0x210   : > { %v3331_v32 = vpop.f32.mrf.mxu0  ;;  %v2639_v21 = vpop.f32.mrf.mxu1 }
 0x211   : > { %v2584_v43 = vadd.f32 %v3331_v32, %v5078_v30  ;;  %v2696_v10 = vmax.f32 %v2648_v45, 0.0  ;;  %v2640_v19 = vadd.f32 %v5078_v30, %v2639_v21 }
 0x212   : > { %v2575_v40 = vpop.f32.mrf.mxu0  ;;  %v3348_v33 = vpop.f32.mrf.mxu1 }
 0x213   : > { %v2680_v54 = vmax.f32 %v2584_v43, 0.0  ;;  %2728 = vst.msk [vmem:[%s5085_s20 + $0xd0] sm:$0xff] %vm2264_vm10, %v2696_v10  ;;  %v2576_v61 = vadd.f32 %v5078_v30, %v2575_v40  ;;  %v2694_v42 = vmax.f32 %v2640_v19, 0.0  ;;  %v2651_v23 = vadd.f32 %v3348_v33, %v5078_v30 }
 0x214   : > { %v3332_v16 = vpop.f32.mrf.mxu0  ;;  %v2642_v47 = vpop.f32.mrf.mxu1 }
 0x215   : > { %2712 = vst.msk [vmem:[%s5085_s20 + $0x50] sm:$0xff] %vm2264_vm10, %v2680_v54  ;;  %v2678_v12 = vmax.f32 %v2576_v61, 0.0  ;;  %2726 = vst.msk [vmem:[%s5085_s20 + $0xc0] sm:$0xff] %vm2264_vm10, %v2694_v42  ;;  %v2587_v36 = vadd.f32 %v3332_v16, %v5078_v30  ;;  %v2697_v15 = vmax.f32 %v2651_v23, 0.0  ;;  %v2643_v63 = vadd.f32 %v5078_v30, %v2642_v47 }
 0x216   : > { %v2578_v48 = vpop.f32.mrf.mxu0 }
 0x217   : > { %2710 = vst.msk [vmem:[%s5085_s20 + $0x40] sm:$0xff] %vm2264_vm10, %v2678_v12  ;;  %v2681_v46 = vmax.f32 %v2587_v36, 0.0  ;;  %2729 = vst.msk [vmem:[%s5085_s20 + $0xd8] sm:$0xff] %vm2264_vm10, %v2697_v15  ;;  %v2579_v34 = vadd.f32 %v5078_v30, %v2578_v48  ;;  %v2695_v60 = vmax.f32 %v2643_v63, 0.0 }
 0x219   : > { %2713 = vst.msk [vmem:[%s5085_s20 + $0x58] sm:$0xff] %vm2264_vm10, %v2681_v46  ;;  %v2679_v51 = vmax.f32 %v2579_v34, 0.0  ;;  %2727 = vst.msk [vmem:[%s5085_s20 + $0xc8] sm:$0xff] %vm2264_vm10, %v2695_v60 }
 0x21b   : > { %2711 = vst.msk [vmem:[%s5085_s20 + $0x48] sm:$0xff] %vm2264_vm10, %v2679_v51 }
 0x24a   : > { %v3351_v55 = vpop.f32.mrf.mxu1 }
 0x24b   : > { %v2664_v14 = vadd.f32 %v3351_v55, %v5078_v30 }
 0x24c   : > { %v2655_v57 = vpop.f32.mrf.mxu1 }
 0x24d   : > { %v3335_v22 = vpop.f32.mrf.mxu0  ;;  %v2700_v8 = vmax.f32 %v2664_v14, 0.0  ;;  %v2656_v29 = vadd.f32 %v5078_v30, %v2655_v57 }
 0x24e   : > { %v2600_v11 = vadd.f32 %v3335_v22, %v5078_v30  ;;  %v3352_v41 = vpop.f32.mrf.mxu1 }
 0x24f   : > { %v2591_v26 = vpop.f32.mrf.mxu0  ;;  %2732 = vst.msk [vmem:[%s5085_s20 + $0xf0] sm:$0xff] %vm2264_vm10, %v2700_v8  ;;  %v2698_v17 = vmax.f32 %v2656_v29, 0.0  ;;  %v2667_v24 = vadd.f32 %v3352_v41, %v5078_v30 }
 0x250   : > { %v2684_v27 = vmax.f32 %v2600_v11, 0.0  ;;  %v2592_v28 = vadd.f32 %v5078_v30, %v2591_v26  ;;  %v2658_v49 = vpop.f32.mrf.mxu1 }
 0x251   : > { %v3336_v38 = vpop.f32.mrf.mxu0  ;;  %2730 = vst.msk [vmem:[%s5085_s20 + $0xe0] sm:$0xff] %vm2264_vm10, %v2698_v17  ;;  %v2701_v58 = vmax.f32 %v2667_v24, 0.0  ;;  %v2659_v35 = vadd.f32 %v5078_v30, %v2658_v49 }
 0x252   : > { %2716 = vst.msk [vmem:[%s5085_s20 + $0x70] sm:$0xff] %vm2264_vm10, %v2684_v27  ;;  %v2682_v2 = vmax.f32 %v2592_v28, 0.0  ;;  %v2603_v62 = vadd.f32 %v3336_v38, %v5078_v30 }
 0x253   : > { %v2594_v53 = vpop.f32.mrf.mxu0  ;;  %2733 = vst.msk [vmem:[%s5085_s20 + $0xf8] sm:$0xff] %vm2264_vm10, %v2701_v58  ;;  %v2699_v18 = vmax.f32 %v2659_v35, 0.0 }
 0x254   : > { %2714 = vst.msk [vmem:[%s5085_s20 + $0x60] sm:$0xff] %vm2264_vm10, %v2682_v2  ;;  %v2685_v59 = vmax.f32 %v2603_v62, 0.0  ;;  %v2595_v6 = vadd.f32 %v5078_v30, %v2594_v53 }
 0x255   : > { %2731 = vst.msk [vmem:[%s5085_s20 + $0xe8] sm:$0xff] %vm2264_vm10, %v2699_v18 }
 0x256   : > { %2717 = vst.msk [vmem:[%s5085_s20 + $0x78] sm:$0xff] %vm2264_vm10, %v2685_v59  ;;  %v2683_v50 = vmax.f32 %v2595_v6, 0.0 }
 0x258   : > { %2715 = vst.msk [vmem:[%s5085_s20 + $0x68] sm:$0xff] %vm2264_vm10, %v2683_v50 }
 0x259 PF: > { %s13_s14 = sadd.s32 1, %s3486_s14   ;;  %s5233_s12 = smov %s3482_s13 }
 0x25a   : > { %p10_p5 = scmp.ge.s32.totalorder %s13_s14, 4   ;;  %s5234_s13 = smov %s5236_s15 }
 0x25c   :  { %12 = sbr.rel (!%p10_p5) target bundleno = 2 (0x2), region = 65 }

</bundles_post_ra>
